<compile_context>
chip_gen: v7x
topology: tpu7x:2x2x1
jax: 0.10.0
libtpu: 0.0.40
codegen_flags: <defaults>
</compile_context>

<pallas_src>
from functools import partial

import numpy as np
import jax
import jax.numpy as jnp
from jax import lax
from jax.experimental import pallas as pl
from jax.experimental.pallas import tpu as pltpu


# ----------------------------------------------------------------------------- #
# Pallas kernel
# ----------------------------------------------------------------------------- #
def _fused_block_kernel(up_ref, bw1_ref, brow1_ref, browsc_ref, bw2_ref,
                        brow2_ref, noise_ref, strength_ref, out_ref, p_ref):
    # up_ref      : (H, W*C1)                bf16  upsampled activation, row-flat (one image)
    # bw1_ref     : (3*W*C1, W*C1 + W*C2)    bf16  banded [conv1 | shortcut] weights
    # brow1_ref   : (1, W*C1)                f32   conv1 bias tiled over x
    # browsc_ref  : (1, W*C2)                f32   shortcut bias tiled over x
    # bw2_ref     : (3*W*C1, W*C2)           bf16  banded conv2 weight
    # brow2_ref   : (1, W*C2)                f32   conv2 bias tiled over x
    # noise_ref   : (H, W*C2)                f32   per-pixel noise, channel-repeated
    # strength_ref: (1,) in SMEM             f32   noise_strength scalar
    # out_ref     : (H, W*C2)                f32   output rows (NHWC flattened over (x, c))
    # p_ref       : VMEM (H+2, W*C1)         f32   vertically zero-padded row scratch
    H, WC1 = up_ref.shape
    WC2 = out_ref.shape[1]

    # ---- vertical zero halo (horizontal padding lives in the banded weights) --
    zrow = jnp.zeros((1, WC1), jnp.float32)
    p_ref[0:1, :] = zrow
    p_ref[H + 1:H + 2, :] = zrow
    p_ref[1:H + 1, :] = up_ref[...].astype(jnp.float32)

    # ---- lane-dense LHS: the three dy-shifted row blocks, concatenated --------
    # Each piece is exactly W*C1 lanes, so the lane-concat is tile-aligned.
    def lhs():
        return jnp.concatenate(
            [p_ref[0:H, :], p_ref[1:H + 1, :], p_ref[2:H + 2, :]], axis=1
        ).astype(jnp.bfloat16)

    # ---- stage 1: conv1 (C1->C1) + shortcut conv (C1->C2) in ONE MXU matmul ---
    r1 = jnp.dot(lhs(), bw1_ref[...], preferred_element_type=jnp.float32)
    h1 = jnp.maximum(r1[:, :WC1] + brow1_ref[...], 0.0)     # ConvBNReLU #1 (rows, x*C1+c)
    shortcut = r1[:, WC1:] + browsc_ref[...]                 # ConvBN (no ReLU)

    # ---- stage 2: conv2 (C1->C2); reuse the scratch (halo rows still zero) ----
    p_ref[1:H + 1, :] = h1
    h2 = jnp.maximum(
        jnp.dot(lhs(), bw2_ref[...], preferred_element_type=jnp.float32)
        + brow2_ref[...], 0.0)                               # ConvBNReLU #2

    # ---- noise + residual epilogue (f32, fully lane-dense) --------------------
    out_ref[...] = h2 + noise_ref[...] * strength_ref[0] + shortcut


# ----------------------------------------------------------------------------- #
# JAX glue
# ----------------------------------------------------------------------------- #
def _bilinear_up2_align_corners(x):
    """x: (N, H, W, C) -> (N, 2H, 2W, C), bilinear, align_corners=True."""
    N, H, W, C = x.shape
    Ho, Wo = 2 * H, 2 * W

    def coords(n_in, n_out):
        pos = jnp.arange(n_out, dtype=jnp.float32) * (n_in - 1) / (n_out - 1)
        lo = jnp.floor(pos).astype(jnp.int32)
        frac = pos - lo.astype(jnp.float32)
        hi = jnp.minimum(lo + 1, n_in - 1)
        return lo, hi, frac

    y0, y1, fy = coords(H, Ho)
    x0, x1, fx = coords(W, Wo)

    r0 = x[:, y0]
    r1 = x[:, y1]

    def lerp_w(r):
        a = r[:, :, x0, :]
        b = r[:, :, x1, :]
        return a * (1.0 - fx)[None, None, :, None] + b * fx[None, None, :, None]

    top = lerp_w(r0)
    bot = lerp_w(r1)
    return top * (1.0 - fy)[None, :, None, None] + bot * fy[None, :, None, None]


def _band_indicator(W):
    """(3, W, W) constant: ind[dx, x_src, x_out] = 1 iff x_src == x_out + dx - 1."""
    ind = np.zeros((3, W, W), np.float32)
    for dx in range(3):
        for xo in range(W):
            xs = xo + dx - 1
            if 0 <= xs < W:
                ind[dx, xs, xo] = 1.0
    return jnp.asarray(ind)


def _banded_weight(w_hwio, ind):
    """(3,3,Cin,Cout) conv weight -> (3*W*Cin, W*Cout) block-banded matmul weight.

    Row index = dy*(W*Cin) + x_src*Cin + ci ; col index = x_out*Cout + co.
    SAME zero-padding along x is implicit (out-of-range taps are absent).
    """
    _, _, Cin, Cout = w_hwio.shape
    W = ind.shape[1]
    B = jnp.einsum('dso,ydic->ysioc', ind, w_hwio)     # (3, W, Cin, W, Cout)
    return B.reshape(3 * W * Cin, W * Cout)


def make_params(imsize, nc1, nc2, key):
    """Deterministic parameter init (Conv weights + folded BatchNorm + noise buffers)."""
    ks = jax.random.split(key, 8)

    def conv_w(k, cout, cin, ksz=3):
        bound = (1.0 / (cin * ksz * ksz)) ** 0.5
        return jax.random.uniform(k, (cout, cin, ksz, ksz), jnp.float32, -bound, bound)

    def bn(k, c):
        k1, k2, k3, k4 = jax.random.split(k, 4)
        gamma = 1.0 + 0.1 * jax.random.normal(k1, (c,), jnp.float32)
        beta = 0.1 * jax.random.normal(k2, (c,), jnp.float32)
        mean = 0.1 * jax.random.normal(k3, (c,), jnp.float32)
        var = 0.9 + 0.2 * jax.random.uniform(k4, (c,), jnp.float32)
        return gamma, beta, mean, var

    def fold(w_oihw, bnp, eps=1e-5):
        gamma, beta, mean, var = bnp
        scale = gamma / jnp.sqrt(var + eps)
        w = w_oihw * scale[:, None, None, None]
        b = beta - mean * scale
        return jnp.transpose(w, (2, 3, 1, 0)), b      # HWIO, (Cout,)

    w1, b1 = fold(conv_w(ks[0], nc1, nc1), bn(ks[1], nc1))     # main conv #1
    w2, b2 = fold(conv_w(ks[2], nc2, nc1), bn(ks[3], nc2))     # main conv #2
    wsc, bsc = fold(conv_w(ks[4], nc2, nc1), bn(ks[5], nc2))   # shortcut conv

    noise_const = jax.random.normal(ks[6], (imsize, imsize), jnp.float32)
    noise_strength = jnp.zeros((), jnp.float32)   # matches nn.Parameter(torch.zeros([]))
    return dict(w1=w1, b1=b1, w2=w2, b2=b2, wsc=wsc, bsc=bsc,
                noise_const=noise_const, noise_strength=noise_strength)


def _build_noise(params, noise_mode, N, H, W, rng_key):
    if noise_mode == 'random':
        if rng_key is None:
            rng_key = jax.random.PRNGKey(0)
        return jax.random.normal(rng_key, (N, H, W), jnp.float32)
    elif noise_mode == 'const':
        return jnp.broadcast_to(params['noise_const'][None], (N, H, W))
    return jnp.zeros((N, H, W), jnp.float32)


@partial(jax.jit, static_argnames=('noise_mode',))
def forward(x_nchw, params, noise_mode='const', rng_key=None, noise_strength=None):
    """QuantSimpleNoiseResUpConvBlock.forward; x_nchw is (N, nc1, H, W)."""
    N, C1, Hin, Win = x_nchw.shape
    x = jnp.transpose(x_nchw, (0, 2, 3, 1)).astype(jnp.float32)   # NCHW -> NHWC
    up = _bilinear_up2_align_corners(x)                           # (N, H, W, C1) f32
    H, W = up.shape[1], up.shape[2]
    C2 = params['w2'].shape[-1]
    assert H % 8 == 0, f"upsampled height {H} must be a multiple of 8 (sublane tile)"

    # Banded (Toeplitz-along-x) weights; conv1 & shortcut concatenated along the
    # output so they share one MXU matmul.  bf16 operands, f32 accumulation.
    ind = _band_indicator(W)
    bw1 = jnp.concatenate([_banded_weight(params['w1'], ind),
                           _banded_weight(params['wsc'], ind)],
                          axis=1).astype(jnp.bfloat16)            # (3*W*C1, W*(C1+C2))
    bw2 = _banded_weight(params['w2'], ind).astype(jnp.bfloat16)  # (3*W*C1, W*C2)

    brow1 = jnp.tile(params['b1'], W).reshape(1, W * C1)          # bias tiled over x
    browsc = jnp.tile(params['bsc'], W).reshape(1, W * C2)
    brow2 = jnp.tile(params['b2'], W).reshape(1, W * C2)

    if noise_strength is None:
        noise_strength = params['noise_strength']
    noise = _build_noise(params, noise_mode, N, H, W, rng_key)              # (N, H, W)
    noise_rows = jnp.repeat(noise, C2, axis=-1).reshape(N * H, W * C2)      # lane-dense
    strength = jnp.reshape(noise_strength, (1,)).astype(jnp.float32)

    up_rows = up.astype(jnp.bfloat16).reshape(N * H, W * C1)                # free view

    out_rows = pl.pallas_call(
        _fused_block_kernel,
        out_shape=jax.ShapeDtypeStruct((N * H, W * C2), jnp.float32),
        grid_spec=pltpu.PrefetchScalarGridSpec(
            num_scalar_prefetch=0,
            grid=(N,),
            in_specs=[
                pl.BlockSpec((H, W * C1), lambda n: (n, 0)),                  # activation rows
                pl.BlockSpec((3 * W * C1, W * (C1 + C2)), lambda n: (0, 0)),  # [conv1|shortcut]
                pl.BlockSpec((1, W * C1), lambda n: (0, 0)),                  # b1 rows
                pl.BlockSpec((1, W * C2), lambda n: (0, 0)),                  # b_shortcut rows
                pl.BlockSpec((3 * W * C1, W * C2), lambda n: (0, 0)),         # conv2
                pl.BlockSpec((1, W * C2), lambda n: (0, 0)),                  # b2 rows
                pl.BlockSpec((H, W * C2), lambda n: (n, 0)),                  # noise rows
                pl.BlockSpec(memory_space=pltpu.MemorySpace.SMEM),            # noise_strength
            ],
            out_specs=pl.BlockSpec((H, W * C2), lambda n: (n, 0)),
            scratch_shapes=[
                pltpu.VMEM((H + 2, W * C1), jnp.float32),   # zero-halo row scratch (reused)
            ],
        ),
        compiler_params=pltpu.CompilerParams(
            dimension_semantics=("parallel",),              # batch images independent
            vmem_limit_bytes=32 * 1024 * 1024),
    )(up_rows, bw1, brow1, browsc, bw2, brow2, noise_rows, strength)

    out = out_rows.reshape(N, H, W, C2)                     # free view of the row layout
    return jnp.transpose(out, (0, 3, 1, 2))                 # NHWC -> NCHW


# ----------------------------------------------------------------------------- #
# Pure-JAX reference (for correctness check)
# ----------------------------------------------------------------------------- #
def reference_forward(x_nchw, params, noise_mode='const', rng_key=None,
                      noise_strength=None):
    N, C1, Hin, Win = x_nchw.shape
    x = jnp.transpose(x_nchw, (0, 2, 3, 1)).astype(jnp.float32)
    up = _bilinear_up2_align_corners(x)
    H, W = up.shape[1], up.shape[2]

    def conv(inp, w, b):
        y = lax.conv_general_dilated(inp, w, (1, 1), 'SAME',
                                     dimension_numbers=('NHWC', 'HWIO', 'NHWC'))
        return y + b[None, None, None, :]

    h1 = jax.nn.relu(conv(up, params['w1'], params['b1']))
    h2 = jax.nn.relu(conv(h1, params['w2'], params['b2']))
    sc = conv(up, params['wsc'], params['bsc'])

    if noise_strength is None:
        noise_strength = params['noise_strength']
    noise = _build_noise(params, noise_mode, N, H, W, rng_key)
    out_nhwc = h2 + noise[:, :, :, None] * noise_strength + sc
    return jnp.transpose(out_nhwc, (0, 3, 1, 2))


# ----------------------------------------------------------------------------- #
if __name__ == "__main__":
    key = jax.random.PRNGKey(0)
    kx, kp = jax.random.split(key, 2)

    N, nc1, nc2 = 2, 4, 8
    Hin = Win = 16
    imsize = 2 * Hin                     # upsampled spatial size (module contract)

    params = make_params(imsize, nc1, nc2, kp)
    x = jax.random.normal(kx, (N, nc1, Hin, Win), jnp.float32)

    # Module-faithful call (noise_strength is the zero-initialized parameter).
    y = jax.block_until_ready(forward(x, params, noise_mode='const'))
    y_ref = reference_forward(x, params, noise_mode='const')
    assert y.shape == (N, nc2, imsize, imsize), y.shape
    # Tolerance reflects bf16 MXU operands (f32 accumulation / f32 epilogue).
    assert jnp.allclose(y, y_ref, rtol=5e-2, atol=5e-2), \
        float(jnp.max(jnp.abs(y - y_ref)))

    # Also exercise the noise path with a non-zero strength through the same kernel.
    y2 = jax.block_until_ready(
        forward(x, params, noise_mode='const', noise_strength=jnp.float32(0.25)))
    y2_ref = reference_forward(x, params, noise_mode='const',
                               noise_strength=jnp.float32(0.25))
    assert jnp.allclose(y2, y2_ref, rtol=5e-2, atol=5e-2), \
        float(jnp.max(jnp.abs(y2 - y2_ref)))

    print("KERNEL_OK")
</pallas_src>

<mosaic_0001>
module attributes {stable_mosaic.version = 11 : i64} {
  func.func @_fused_block_kernel(%arg0: i32, %arg1: memref<32x128xbf16, #tpu.memory_space<vmem>>, %arg2: memref<384x384xbf16, #tpu.memory_space<vmem>>, %arg3: memref<1x128xf32, #tpu.memory_space<vmem>>, %arg4: memref<1x256xf32, #tpu.memory_space<vmem>>, %arg5: memref<384x256xbf16, #tpu.memory_space<vmem>>, %arg6: memref<1x256xf32, #tpu.memory_space<vmem>>, %arg7: memref<32x256xf32, #tpu.memory_space<vmem>>, %arg8: memref<1xf32, #tpu.memory_space<smem>>, %arg9: memref<32x256xf32, #tpu.memory_space<vmem>>, %arg10: memref<34x128xf32, #tpu.memory_space<vmem>>) attributes {dimension_semantics = [#tpu.dimension_semantics<parallel>], iteration_bounds = array<i64: 2>, scalar_prefetch = 0 : i64, scratch_operands = 1 : i64, tpu.core_type = #tpu.core_type<tc>, window_params = [{transform_indices = @transform_0, window_bounds = array<i64: 32, 128>}, {pipeline_mode = #tpu.pipeline_mode<synchronous>, transform_indices = @transform_1, window_bounds = array<i64: 384, 384>}, {pipeline_mode = #tpu.pipeline_mode<synchronous>, transform_indices = @transform_2, window_bounds = array<i64: 1, 128>}, {pipeline_mode = #tpu.pipeline_mode<synchronous>, transform_indices = @transform_3, window_bounds = array<i64: 1, 256>}, {pipeline_mode = #tpu.pipeline_mode<synchronous>, transform_indices = @transform_4, window_bounds = array<i64: 384, 256>}, {pipeline_mode = #tpu.pipeline_mode<synchronous>, transform_indices = @transform_5, window_bounds = array<i64: 1, 256>}, {transform_indices = @transform_6, window_bounds = array<i64: 32, 256>}, {transform_indices = @transform_7, window_bounds = array<i64: 1>}, {transform_indices = @transform_8, window_bounds = array<i64: 32, 256>}]} {
    %cst = arith.constant 0.000000e+00 : f32
    %0 = vector.broadcast %cst : f32 to vector<1x128xf32>
    %c0 = arith.constant 0 : index
    %c0_0 = arith.constant 0 : index
    %1 = vector.load %arg10[%c0, %c0_0] : memref<34x128xf32, #tpu.memory_space<vmem>>, vector<1x128xf32>
    tpu.vector_store %arg10[%c0, %c0_0], %0 {strides = array<i32>} : memref<34x128xf32, #tpu.memory_space<vmem>>, vector<1x128xf32>,
    %c33 = arith.constant 33 : index
    %c0_1 = arith.constant 0 : index
    %2 = vector.load %arg10[%c33, %c0_1] : memref<34x128xf32, #tpu.memory_space<vmem>>, vector<1x128xf32>
    tpu.vector_store %arg10[%c33, %c0_1], %0 {strides = array<i32>} : memref<34x128xf32, #tpu.memory_space<vmem>>, vector<1x128xf32>,
    %c0_2 = arith.constant 0 : index
    %c0_3 = arith.constant 0 : index
    %3 = vector.load %arg1[%c0_2, %c0_3] : memref<32x128xbf16, #tpu.memory_space<vmem>>, vector<32x128xbf16>
    %4 = arith.extf %3 : vector<32x128xbf16> to vector<32x128xf32>
    %c1 = arith.constant 1 : index
    %c0_4 = arith.constant 0 : index
    %5 = vector.load %arg10[%c1, %c0_4] : memref<34x128xf32, #tpu.memory_space<vmem>>, vector<32x128xf32>
    tpu.vector_store %arg10[%c1, %c0_4], %4 {strides = array<i32>} : memref<34x128xf32, #tpu.memory_space<vmem>>, vector<32x128xf32>,
    %c0_5 = arith.constant 0 : index
    %c0_6 = arith.constant 0 : index
    %6 = vector.load %arg10[%c0_5, %c0_6] : memref<34x128xf32, #tpu.memory_space<vmem>>, vector<32x128xf32>
    %c1_7 = arith.constant 1 : index
    %c0_8 = arith.constant 0 : index
    %7 = vector.load %arg10[%c1_7, %c0_8] : memref<34x128xf32, #tpu.memory_space<vmem>>, vector<32x128xf32>
    %c2 = arith.constant 2 : index
    %c0_9 = arith.constant 0 : index
    %8 = vector.load %arg10[%c2, %c0_9] : memref<34x128xf32, #tpu.memory_space<vmem>>, vector<32x128xf32>
    %9 = tpu.concatenate %6, %7, %8 in 1 : vector<32x128xf32>, vector<32x128xf32>, vector<32x128xf32> -> vector<32x384xf32>
    %10 = arith.truncf %9 : vector<32x384xf32> to vector<32x384xbf16>
    %c0_10 = arith.constant 0 : index
    %c0_11 = arith.constant 0 : index
    %11 = vector.load %arg2[%c0_10, %c0_11] : memref<384x384xbf16, #tpu.memory_space<vmem>>, vector<384x384xbf16>
    %cst_12 = arith.constant dense<0.000000e+00> : vector<32x384xf32>
    %12 = tpu.matmul %10, %11, %cst_12 {dimension_numbers = #tpu.dot_dimension_numbers<[1], [0], [0], [1], [0, 0, 1, 1], [], []>} : vector<32x384xbf16>, vector<384x384xbf16>, vector<32x384xf32> -> vector<32x384xf32>
    %13 = vector.extract_strided_slice %12 {offsets = [0, 0], sizes = [32, 128], strides = [1, 1]} : vector<32x384xf32> to vector<32x128xf32>
    %c0_13 = arith.constant 0 : index
    %c0_14 = arith.constant 0 : index
    %14 = vector.load %arg3[%c0_13, %c0_14] : memref<1x128xf32, #tpu.memory_space<vmem>>, vector<1x128xf32>
    %15 = vector.broadcast %14 : vector<1x128xf32> to vector<32x128xf32>
    %16 = arith.addf %13, %15 : vector<32x128xf32>
    %cst_15 = arith.constant 0.000000e+00 : f32
    %17 = vector.broadcast %cst_15 : f32 to vector<32x128xf32>
    %18 = arith.maximumf %16, %17 : vector<32x128xf32>
    %19 = vector.extract_strided_slice %12 {offsets = [0, 128], sizes = [32, 256], strides = [1, 1]} : vector<32x384xf32> to vector<32x256xf32>
    %c0_16 = arith.constant 0 : index
    %c0_17 = arith.constant 0 : index
    %20 = vector.load %arg4[%c0_16, %c0_17] : memref<1x256xf32, #tpu.memory_space<vmem>>, vector<1x256xf32>
    %21 = vector.broadcast %20 : vector<1x256xf32> to vector<32x256xf32>
    %22 = arith.addf %19, %21 : vector<32x256xf32>
    %c1_18 = arith.constant 1 : index
    %c0_19 = arith.constant 0 : index
    %23 = vector.load %arg10[%c1_18, %c0_19] : memref<34x128xf32, #tpu.memory_space<vmem>>, vector<32x128xf32>
    tpu.vector_store %arg10[%c1_18, %c0_19], %18 {strides = array<i32>} : memref<34x128xf32, #tpu.memory_space<vmem>>, vector<32x128xf32>,
    %c0_20 = arith.constant 0 : index
    %c0_21 = arith.constant 0 : index
    %24 = vector.load %arg10[%c0_20, %c0_21] : memref<34x128xf32, #tpu.memory_space<vmem>>, vector<32x128xf32>
    %c1_22 = arith.constant 1 : index
    %c0_23 = arith.constant 0 : index
    %25 = vector.load %arg10[%c1_22, %c0_23] : memref<34x128xf32, #tpu.memory_space<vmem>>, vector<32x128xf32>
    %c2_24 = arith.constant 2 : index
    %c0_25 = arith.constant 0 : index
    %26 = vector.load %arg10[%c2_24, %c0_25] : memref<34x128xf32, #tpu.memory_space<vmem>>, vector<32x128xf32>
    %27 = tpu.concatenate %24, %25, %26 in 1 : vector<32x128xf32>, vector<32x128xf32>, vector<32x128xf32> -> vector<32x384xf32>
    %28 = arith.truncf %27 : vector<32x384xf32> to vector<32x384xbf16>
    %c0_26 = arith.constant 0 : index
    %c0_27 = arith.constant 0 : index
    %29 = vector.load %arg5[%c0_26, %c0_27] : memref<384x256xbf16, #tpu.memory_space<vmem>>, vector<384x256xbf16>
    %cst_28 = arith.constant dense<0.000000e+00> : vector<32x256xf32>
    %30 = tpu.matmul %28, %29, %cst_28 {dimension_numbers = #tpu.dot_dimension_numbers<[1], [0], [0], [1], [0, 0, 1, 1], [], []>} : vector<32x384xbf16>, vector<384x256xbf16>, vector<32x256xf32> -> vector<32x256xf32>
    %c0_29 = arith.constant 0 : index
    %c0_30 = arith.constant 0 : index
    %31 = vector.load %arg6[%c0_29, %c0_30] : memref<1x256xf32, #tpu.memory_space<vmem>>, vector<1x256xf32>
    %32 = vector.broadcast %31 : vector<1x256xf32> to vector<32x256xf32>
    %33 = arith.addf %30, %32 : vector<32x256xf32>
    %cst_31 = arith.constant 0.000000e+00 : f32
    %34 = vector.broadcast %cst_31 : f32 to vector<32x256xf32>
    %35 = arith.maximumf %33, %34 : vector<32x256xf32>
    %c0_32 = arith.constant 0 : index
    %c0_33 = arith.constant 0 : index
    %36 = vector.load %arg7[%c0_32, %c0_33] : memref<32x256xf32, #tpu.memory_space<vmem>>, vector<32x256xf32>
    %c0_34 = arith.constant 0 : index
    %37 = memref.load %arg8[%c0_34] : memref<1xf32, #tpu.memory_space<smem>>
    %38 = vector.broadcast %37 : f32 to vector<32x256xf32>
    %39 = arith.mulf %36, %38 : vector<32x256xf32>
    %40 = arith.addf %35, %39 : vector<32x256xf32>
    %41 = arith.addf %40, %22 : vector<32x256xf32>
    %c0_35 = arith.constant 0 : index
    %c0_36 = arith.constant 0 : index
    %42 = vector.load %arg9[%c0_35, %c0_36] : memref<32x256xf32, #tpu.memory_space<vmem>>, vector<32x256xf32>
    tpu.vector_store %arg9[%c0_35, %c0_36], %41 {strides = array<i32>} : memref<32x256xf32, #tpu.memory_space<vmem>>, vector<32x256xf32>,
    return
  }
  func.func @transform_0(%arg0: i32) -> (i32, i32) {
    %c0_i32 = arith.constant 0 : i32
    %c0_i32_0 = arith.constant 0 : i32
    return %arg0, %c0_i32 : i32, i32
  }
  func.func @transform_1(%arg0: i32) -> (i32, i32) {
    %c0_i32 = arith.constant 0 : i32
    %c0_i32_0 = arith.constant 0 : i32
    %c0_i32_1 = arith.constant 0 : i32
    return %c0_i32, %c0_i32_0 : i32, i32
  }
  func.func @transform_2(%arg0: i32) -> (i32, i32) {
    %c0_i32 = arith.constant 0 : i32
    %c0_i32_0 = arith.constant 0 : i32
    %c0_i32_1 = arith.constant 0 : i32
    return %c0_i32, %c0_i32_0 : i32, i32
  }
  func.func @transform_3(%arg0: i32) -> (i32, i32) {
    %c0_i32 = arith.constant 0 : i32
    %c0_i32_0 = arith.constant 0 : i32
    %c0_i32_1 = arith.constant 0 : i32
    return %c0_i32, %c0_i32_0 : i32, i32
  }
  func.func @transform_4(%arg0: i32) -> (i32, i32) {
    %c0_i32 = arith.constant 0 : i32
    %c0_i32_0 = arith.constant 0 : i32
    %c0_i32_1 = arith.constant 0 : i32
    return %c0_i32, %c0_i32_0 : i32, i32
  }
  func.func @transform_5(%arg0: i32) -> (i32, i32) {
    %c0_i32 = arith.constant 0 : i32
    %c0_i32_0 = arith.constant 0 : i32
    %c0_i32_1 = arith.constant 0 : i32
    return %c0_i32, %c0_i32_0 : i32, i32
  }
  func.func @transform_6(%arg0: i32) -> (i32, i32) {
    %c0_i32 = arith.constant 0 : i32
    %c0_i32_0 = arith.constant 0 : i32
    return %arg0, %c0_i32 : i32, i32
  }
  func.func @transform_7(%arg0: i32) -> i32 {
    %c0_i32 = arith.constant 0 : i32
    %c0_i32_0 = arith.constant 0 : i32
    return %c0_i32 : i32
  }
  func.func @transform_8(%arg0: i32) -> (i32, i32) {
    %c0_i32 = arith.constant 0 : i32
    %c0_i32_0 = arith.constant 0 : i32
    return %arg0, %c0_i32 : i32, i32
  }
}

</mosaic_0001>

<bundles_post_ra>
// kernel: tile.23
= control target key start
LH: loop header
LB: loop body
LE: loop exit
PB: predicated region body
PF: predicated region fallthrough
CT: control target
= control target key end

     0   :  { %s40_s0 = inlined_call_operand.vmem [shape: f32[8], index: 0, kind: input, shape index: {}]   ;;  %s41_s1 = inlined_call_operand.vmem [shape: f32[32,8], index: 1, kind: output, shape index: {}]  }
   0x1   :  { %v4_v0 = vld [vmem:[%s40_s0] ss:$0 sm:$0xff] }
   0x2   :  { %5 = vst [vmem:[%s41_s1] sm:$0xff] %v4_v0  ;;  %12 = vst [vmem:[%s41_s1 + $0x8] sm:$0xff] %v4_v0 }
   0x3   :  { %13 = vst [vmem:[%s41_s1 + $0x10] sm:$0xff] %v4_v0  ;;  %14 = vst [vmem:[%s41_s1 + $0x18] sm:$0xff] %v4_v0 }

// kernel: tile.24
= control target key start
LH: loop header
LB: loop body
LE: loop exit
PB: predicated region body
PF: predicated region fallthrough
CT: control target
= control target key end

     0   :  { %s7_s6 = smov 3  ;;  %s21_s9 = smov 3  ;;  %vm4_vm0 = vcmask 64512   ;;  %vm11_vm1 = vcmask 1048512   ;;  %vm18_vm2 = vcmask 982912   ;;  %vm25_vm3 = vcmask 917312   ;;  %s232_s0 = inlined_call_operand.vmem [shape: f32[32,8], index: 0, kind: input, shape index: {}]   ;;  %s233_s1 = inlined_call_operand.vmem [shape: f32[1,256], index: 1, kind: output, shape index: {}]  }
   0x1   :  { %v122_v0 = vld [vmem:[%s232_s0 + $0xf] ss:$16 sm:%s7_s6]   ;;  %s153_s10 = smov 120   ;;  %v124_v1 = vld [vmem:[%s232_s0 + $0xd] ss:$16 sm:%s21_s9]   ;;  %s14_s13 = smov 3 }
   0x2   :  { %9 = vrot.lane.b32.xlu0 %v122_v0, %s153_s10  ;;  %s154_s14 = smov 104   ;;  %v123_v2 = vld [vmem:[%s232_s0 + $0xe] ss:$16 sm:%s14_s13]   ;;  %s28_s17 = smov 3  ;;  %vm32_vm4 = vcmask 851712   ;;  %vm39_vm5 = vcmask 786112  }
   0x3   :  { %23 = vrot.lane.b32.xlu1 %v124_v1, %s154_s14  ;;  %v125_v3 = vld [vmem:[%s232_s0 + $0xc] ss:$16 sm:%s28_s17]   ;;  %s35_s20 = smov 3  ;;  %s42_s21 = smov 3  ;;  %vm46_vm6 = vcmask 720512   ;;  %vm53_vm7 = vcmask 654912  }
   0x4   :  { %s155_s22 = smov 112   ;;  %s156_s23 = smov 96   ;;  %v126_v4 = vld [vmem:[%s232_s0 + $0xb] ss:$16 sm:%s35_s20]   ;;  %v127_v5 = vld [vmem:[%s232_s0 + $0xa] ss:$16 sm:%s42_s21]  }
   0x5   :  { %s49_s28 = smov 3  ;;  %s56_s29 = smov 3  ;;  %vm60_vm8 = vcmask 589312   ;;  %vm67_vm9 = vcmask 523712   ;;  %vm74_vm10 = vcmask 458112   ;;  %vm81_vm11 = vcmask 392512  }
   0x6   :  { %16 = vrot.lane.b32.xlu0 %v123_v2, %s155_s22  ;;  %s157_s30 = smov 88   ;;  %s158_s2 = smov 80   ;;  %v128_v6 = vld [vmem:[%s232_s0 + $0x9] ss:$16 sm:%s49_s28]   ;;  %vm88_vm12 = vcmask 326912   ;;  %vm95_vm13 = vcmask 261312  }
   0x7   :  { %30 = vrot.lane.b32.xlu1 %v125_v3, %s156_s23  ;;  %v129_v7 = vld [vmem:[%s232_s0 + $0x8] ss:$16 sm:%s56_s29]   ;;  %s63_s7 = smov 3  ;;  %s70_s8 = smov 3  ;;  %vm102_vm14 = vcmask 195712   ;;  %vm109_vm15 = vcmask 130112  }
   0x8   :  { %s159_s9 = smov 72   ;;  %s160_s10 = smov 64   ;;  %v130_v8 = vld [vmem:[%s232_s0 + $0x7] ss:$16 sm:%s63_s7]   ;;  %v131_v9 = vld [vmem:[%s232_s0 + $0x6] ss:$16 sm:%s70_s8]  }
   0x9   :  { %s2_s13 = smov 3  ;;  %s77_s16 = smov 3 }
   0xa   :  { %37 = vrot.lane.b32.xlu0 %v126_v4, %s157_s30  ;;  %v3_v10 = vld [vmem:[%s232_s0] ss:$16 sm:%s2_s13]   ;;  %s84_s19 = smov 3  ;;  %s161_s20 = smov 56  }
   0xb   :  { %44 = vrot.lane.b32.xlu1 %v127_v5, %s158_s2  ;;  %5 = vst.msk [vmem:[#allocation0] ss:$8 sm:$0x3] %vm4_vm0, %v3_v10   ;;  %s162_s21 = smov 48   ;;  %v132_v11 = vld [vmem:[%s232_s0 + $0x5] ss:$16 sm:%s77_s16]  }
   0xc   :  { %v133_v12 = vld [vmem:[%s232_s0 + $0x4] ss:$16 sm:%s84_s19]   ;;  %s91_s26 = smov 3  ;;  %s98_s27 = smov 3 }
   0xd   :  { %s163_s28 = smov 40   ;;  %s164_s29 = smov 32   ;;  %v134_v13 = vld [vmem:[%s232_s0 + $0x3] ss:$16 sm:%s91_s26]   ;;  %v135_v14 = vld [vmem:[%s232_s0 + $0x2] ss:$16 sm:%s98_s27]  }
   0xe   :  { %51 = vrot.lane.b32.xlu0 %v128_v6, %s159_s9  ;;  %s105_s5 = smov 3  ;;  %s165_s6 = smov 24  }
   0xf   :  { %58 = vrot.lane.b32.xlu1 %v129_v7, %s160_s10  ;;  %s166_s7 = smov 16   ;;  %v136_v15 = vld [vmem:[%s232_s0 + $0x1] ss:$16 sm:%s105_s5]   ;;  %s167_s0 = smov 8  }
  0x12   :  { %65 = vrot.lane.b32.xlu0 %v130_v8, %s161_s20 }
  0x13   :  { %72 = vrot.lane.b32.xlu1 %v131_v9, %s162_s21 }
  0x16   :  { %79 = vrot.lane.b32.xlu0 %v132_v11, %s163_s28 }
  0x17   :  { %86 = vrot.lane.b32.xlu1 %v133_v12, %s164_s29 }
  0x1a   :  { %93 = vrot.lane.b32.xlu0 %v134_v13, %s165_s6 }
  0x1b   :  { %100 = vrot.lane.b32.xlu1 %v135_v14, %s166_s7 }
  0x1e   :  { %107 = vrot.lane.b32.xlu0 %v136_v15, %s167_s0 }
  0x74   :  { %v10_v16 = vpop.permute.xlu0 %9  }
  0x75   :  { %12 = vst.msk [vmem:[#allocation0] ss:$8 sm:$0x3] %vm11_vm1, %v10_v16   ;;  %v24_v17 = vpop.permute.xlu1 %23  }
  0x78   :  { %v17_v18 = vpop.permute.xlu0 %16  }
  0x79   :  { %19 = vst.msk [vmem:[#allocation0] ss:$8 sm:$0x3] %vm18_vm2, %v17_v18   ;;  %v31_v19 = vpop.permute.xlu1 %30  }
  0x7a   :  { %26 = vst.msk [vmem:[#allocation0] ss:$8 sm:$0x3] %vm25_vm3, %v24_v17  }
  0x7b   :  { %33 = vst.msk [vmem:[#allocation0] ss:$8 sm:$0x3] %vm32_vm4, %v31_v19  }
  0x7c   :  { %v38_v20 = vpop.permute.xlu0 %37  }
  0x7d   :  { %40 = vst.msk [vmem:[#allocation0] ss:$8 sm:$0x3] %vm39_vm5, %v38_v20   ;;  %v45_v21 = vpop.permute.xlu1 %44  }
  0x7e   :  { %47 = vst.msk [vmem:[#allocation0] ss:$8 sm:$0x3] %vm46_vm6, %v45_v21  }
  0x80   :  { %v52_v22 = vpop.permute.xlu0 %51  }
  0x81   :  { %54 = vst.msk [vmem:[#allocation0] ss:$8 sm:$0x3] %vm53_vm7, %v52_v22   ;;  %v59_v23 = vpop.permute.xlu1 %58  }
  0x82   :  { %61 = vst.msk [vmem:[#allocation0] ss:$8 sm:$0x3] %vm60_vm8, %v59_v23  }
  0x84   :  { %v66_v24 = vpop.permute.xlu0 %65  }
  0x85   :  { %68 = vst.msk [vmem:[#allocation0] ss:$8 sm:$0x3] %vm67_vm9, %v66_v24   ;;  %v73_v25 = vpop.permute.xlu1 %72  }
  0x86   :  { %75 = vst.msk [vmem:[#allocation0] ss:$8 sm:$0x3] %vm74_vm10, %v73_v25  }
  0x88   :  { %v80_v26 = vpop.permute.xlu0 %79  }
  0x89   :  { %82 = vst.msk [vmem:[#allocation0] ss:$8 sm:$0x3] %vm81_vm11, %v80_v26   ;;  %v87_v27 = vpop.permute.xlu1 %86  }
  0x8a   :  { %89 = vst.msk [vmem:[#allocation0] ss:$8 sm:$0x3] %vm88_vm12, %v87_v27  }
  0x8c   :  { %v94_v28 = vpop.permute.xlu0 %93  }
  0x8d   :  { %96 = vst.msk [vmem:[#allocation0] ss:$8 sm:$0x3] %vm95_vm13, %v94_v28   ;;  %v101_v29 = vpop.permute.xlu1 %100  }
  0x8e   :  { %103 = vst.msk [vmem:[#allocation0] ss:$8 sm:$0x3] %vm102_vm14, %v101_v29  }
  0x90   :  { %v108_v30 = vpop.permute.xlu0 %107  }
  0x91   :  { %110 = vst.msk [vmem:[#allocation0] ss:$8 sm:$0x3] %vm109_vm15, %v108_v30  }
  0x98   :  { %v114_v31 = vld [vmem:[#allocation0] sm:$0x1]  ;;  %v118_v32 = vld [vmem:[#allocation0 + $0x8] sm:$0x1] }
  0x99   :  { %116 = vst [vmem:[%s233_s1] sm:$0x1] %v114_v31  ;;  %137 = vst [vmem:[%s233_s1 + $0x1] sm:$0x1] %v118_v32 }

// kernel: tile.18
= control target key start
LH: loop header
LB: loop body
LE: loop exit
PB: predicated region body
PF: predicated region fallthrough
CT: control target
= control target key end

     0   :  { %s40_s0 = inlined_call_operand.vmem [shape: f32[4], index: 0, kind: input, shape index: {}]   ;;  %s41_s1 = inlined_call_operand.vmem [shape: f32[32,4], index: 1, kind: output, shape index: {}]  }
   0x1   :  { %v4_v0 = vld [vmem:[%s40_s0] ss:$0 sm:$0xff] }
   0x2   :  { %5 = vst [vmem:[%s41_s1] sm:$0xff] %v4_v0  ;;  %12 = vst [vmem:[%s41_s1 + $0x8] sm:$0xff] %v4_v0 }
   0x3   :  { %13 = vst [vmem:[%s41_s1 + $0x10] sm:$0xff] %v4_v0  ;;  %14 = vst [vmem:[%s41_s1 + $0x18] sm:$0xff] %v4_v0 }

// kernel: tile.19
= control target key start
LH: loop header
LB: loop body
LE: loop exit
PB: predicated region body
PF: predicated region fallthrough
CT: control target
= control target key end

     0   :  { %s259_s10 = smov 124   ;;  %s260_s11 = smov 116   ;;  %vm3_vm0 = vcmask 31744   ;;  %vm9_vm1 = vcmask 1048544   ;;  %vm15_vm2 = vcmask 1015744   ;;  %vm21_vm3 = vcmask 982944   ;;  %s399_s0 = inlined_call_operand.vmem [shape: f32[32,4], index: 0, kind: input, shape index: {}]   ;;  %s400_s1 = inlined_call_operand.vmem [shape: f32[1,128], index: 1, kind: output, shape index: {}]  }
   0x1   :  { %v197_v0 = vld [vmem:[%s399_s0 + $0x1f] sm:$0x1]   ;;  %v199_v1 = vld [vmem:[%s399_s0 + $0x1d] sm:$0x1]   ;;  %v198_v2 = vld [vmem:[%s399_s0 + $0x1e] sm:$0x1]  }
   0x2   :  { %7 = vrot.lane.b32.xlu0 %v197_v0, %s259_s10  ;;  %19 = vrot.lane.b32.xlu1 %v199_v1, %s260_s11  ;;  %v200_v3 = vld [vmem:[%s399_s0 + $0x1c] sm:$0x1]   ;;  %s261_s16 = smov 120   ;;  %s262_s17 = smov 112   ;;  %v201_v4 = vld [vmem:[%s399_s0 + $0x1b] sm:$0x1]  }
   0x3   :  { %v202_v5 = vld [vmem:[%s399_s0 + $0x1a] sm:$0x1]   ;;  %s263_s22 = smov 108   ;;  %s264_s23 = smov 104   ;;  %v203_v6 = vld [vmem:[%s399_s0 + $0x19] sm:$0x1]  }
   0x4   :  { %v204_v7 = vld [vmem:[%s399_s0 + $0x18] sm:$0x1]   ;;  %s265_s28 = smov 100   ;;  %s266_s29 = smov 96   ;;  %v205_v8 = vld [vmem:[%s399_s0 + $0x17] sm:$0x1]  }
   0x5   :  { %v206_v9 = vld [vmem:[%s399_s0 + $0x16] sm:$0x1]   ;;  %v2_v10 = vld [vmem:[%s399_s0] sm:$0x1]   ;;  %s267_s7 = smov 92   ;;  %s268_s8 = smov 88  }
   0x6   :  { %13 = vrot.lane.b32.xlu0 %v198_v2, %s261_s16  ;;  %25 = vrot.lane.b32.xlu1 %v200_v3, %s262_s17  ;;  %4 = vst.msk [vmem:[#allocation0] sm:$0x1] %vm3_vm0, %v2_v10   ;;  %v207_v11 = vld [vmem:[%s399_s0 + $0x15] sm:$0x1]   ;;  %v208_v12 = vld [vmem:[%s399_s0 + $0x14] sm:$0x1]  }
   0x7   :  { %s269_s13 = smov 84   ;;  %s270_s14 = smov 80   ;;  %v209_v13 = vld [vmem:[%s399_s0 + $0x13] sm:$0x1]   ;;  %v210_v14 = vld [vmem:[%s399_s0 + $0x12] sm:$0x1]  }
   0x8   :  { %s271_s19 = smov 76   ;;  %s272_s20 = smov 72   ;;  %v211_v15 = vld [vmem:[%s399_s0 + $0x11] sm:$0x1]   ;;  %v212_v16 = vld [vmem:[%s399_s0 + $0x10] sm:$0x1]  }
   0x9   :  { %s273_s25 = smov 68   ;;  %s274_s26 = smov 64   ;;  %v213_v17 = vld [vmem:[%s399_s0 + $0xf] sm:$0x1]   ;;  %v214_v18 = vld [vmem:[%s399_s0 + $0xe] sm:$0x1]  }
   0xa   :  { %31 = vrot.lane.b32.xlu0 %v201_v4, %s263_s22  ;;  %37 = vrot.lane.b32.xlu1 %v202_v5, %s264_s23  ;;  %s275_s2 = smov 60   ;;  %s276_s3 = smov 56   ;;  %v215_v19 = vld [vmem:[%s399_s0 + $0xd] sm:$0x1]   ;;  %v216_v20 = vld [vmem:[%s399_s0 + $0xc] sm:$0x1]  }
   0xb   :  { %s278_s9 = smov 48   ;;  %v217_v21 = vld [vmem:[%s399_s0 + $0xb] sm:$0x1]   ;;  %v218_v22 = vld [vmem:[%s399_s0 + $0xa] sm:$0x1]   ;;  %s280_s15 = smov 40  }
   0xc   :  { %v219_v23 = vld [vmem:[%s399_s0 + $0x9] sm:$0x1]   ;;  %v220_v24 = vld [vmem:[%s399_s0 + $0x8] sm:$0x1]   ;;  %s282_s21 = smov 32   ;;  %s284_s27 = smov 24  }
   0xd   :  { %v221_v25 = vld [vmem:[%s399_s0 + $0x7] sm:$0x1]   ;;  %v222_v26 = vld [vmem:[%s399_s0 + $0x6] sm:$0x1]   ;;  %v223_v27 = vld [vmem:[%s399_s0 + $0x5] sm:$0x1]  }
   0xe   :  { %43 = vrot.lane.b32.xlu0 %v203_v6, %s265_s28  ;;  %49 = vrot.lane.b32.xlu1 %v204_v7, %s266_s29  ;;  %v224_v28 = vld [vmem:[%s399_s0 + $0x4] sm:$0x1]   ;;  %s286_s4 = smov 16   ;;  %v225_v29 = vld [vmem:[%s399_s0 + $0x3] sm:$0x1]   ;;  %s288_s10 = smov 8  }
   0xf   :  { %v226_v30 = vld [vmem:[%s399_s0 + $0x2] sm:$0x1]   ;;  %v227_v31 = vld [vmem:[%s399_s0 + $0x1] sm:$0x1]   ;;  %s289_s0 = smov 4   ;;  %vm27_vm4 = vcmask 950144  }
  0x10   :  { %vm33_vm5 = vcmask 917344   ;;  %vm39_vm6 = vcmask 884544   ;;  %vm45_vm7 = vcmask 851744   ;;  %vm51_vm8 = vcmask 818944  }
  0x11   :  { %vm57_vm9 = vcmask 786144   ;;  %vm63_vm10 = vcmask 753344   ;;  %vm69_vm11 = vcmask 720544   ;;  %vm75_vm12 = vcmask 687744  }
  0x12   :  { %55 = vrot.lane.b32.xlu0 %v205_v8, %s267_s7  ;;  %61 = vrot.lane.b32.xlu1 %v206_v9, %s268_s8  ;;  %s277_s8 = smov 52   ;;  %vm81_vm13 = vcmask 654944   ;;  %vm87_vm14 = vcmask 622144   ;;  %vm93_vm15 = vcmask 589344   ;;  %vm99_vm0 = vcmask 556544  }
  0x16   :  { %67 = vrot.lane.b32.xlu0 %v207_v11, %s269_s13  ;;  %73 = vrot.lane.b32.xlu1 %v208_v12, %s270_s14  ;;  %s279_s14 = smov 44  }
  0x1a   :  { %79 = vrot.lane.b32.xlu0 %v209_v13, %s271_s19  ;;  %85 = vrot.lane.b32.xlu1 %v210_v14, %s272_s20  ;;  %s281_s20 = smov 36  }
  0x1e   :  { %91 = vrot.lane.b32.xlu0 %v211_v15, %s273_s25  ;;  %97 = vrot.lane.b32.xlu1 %v212_v16, %s274_s26  ;;  %s283_s26 = smov 28  }
  0x22   :  { %103 = vrot.lane.b32.xlu0 %v213_v17, %s275_s2  ;;  %109 = vrot.lane.b32.xlu1 %v214_v18, %s276_s3  ;;  %s285_s3 = smov 20  }
  0x26   :  { %115 = vrot.lane.b32.xlu0 %v215_v19, %s277_s8  ;;  %121 = vrot.lane.b32.xlu1 %v216_v20, %s278_s9  ;;  %s287_s9 = smov 12  }
  0x2a   :  { %127 = vrot.lane.b32.xlu0 %v217_v21, %s279_s14  ;;  %133 = vrot.lane.b32.xlu1 %v218_v22, %s280_s15 }
  0x2e   :  { %139 = vrot.lane.b32.xlu0 %v219_v23, %s281_s20  ;;  %145 = vrot.lane.b32.xlu1 %v220_v24, %s282_s21 }
  0x32   :  { %151 = vrot.lane.b32.xlu0 %v221_v25, %s283_s26  ;;  %157 = vrot.lane.b32.xlu1 %v222_v26, %s284_s27 }
  0x36   :  { %163 = vrot.lane.b32.xlu0 %v223_v27, %s285_s3  ;;  %169 = vrot.lane.b32.xlu1 %v224_v28, %s286_s4 }
  0x3a   :  { %175 = vrot.lane.b32.xlu0 %v225_v29, %s287_s9  ;;  %181 = vrot.lane.b32.xlu1 %v226_v30, %s288_s10 }
  0x3e   :  { %187 = vrot.lane.b32.xlu0 %v227_v31, %s289_s0 }
  0x74   :  { %v8_v32 = vpop.permute.xlu0 %7   ;;  %v20_v33 = vpop.permute.xlu1 %19  }
  0x75   :  { %10 = vst.msk [vmem:[#allocation0] sm:$0x1] %vm9_vm1, %v8_v32   ;;  %vm105_vm1 = vcmask 523744  }
  0x78   :  { %v14_v34 = vpop.permute.xlu0 %13   ;;  %v26_v35 = vpop.permute.xlu1 %25  }
  0x79   :  { %16 = vst.msk [vmem:[#allocation0] sm:$0x1] %vm15_vm2, %v14_v34   ;;  %vm111_vm2 = vcmask 490944  }
  0x7a   :  { %22 = vst.msk [vmem:[#allocation0] sm:$0x1] %vm21_vm3, %v20_v33   ;;  %vm117_vm3 = vcmask 458144  }
  0x7b   :  { %28 = vst.msk [vmem:[#allocation0] sm:$0x1] %vm27_vm4, %v26_v35   ;;  %vm123_vm4 = vcmask 425344  }
  0x7c   :  { %v32_v36 = vpop.permute.xlu0 %31   ;;  %v38_v37 = vpop.permute.xlu1 %37  }
  0x7d   :  { %34 = vst.msk [vmem:[#allocation0] sm:$0x1] %vm33_vm5, %v32_v36   ;;  %vm129_vm5 = vcmask 392544  }
  0x7e   :  { %40 = vst.msk [vmem:[#allocation0] sm:$0x1] %vm39_vm6, %v38_v37   ;;  %vm135_vm6 = vcmask 359744  }
  0x80   :  { %v44_v38 = vpop.permute.xlu0 %43   ;;  %v50_v39 = vpop.permute.xlu1 %49  }
  0x81   :  { %46 = vst.msk [vmem:[#allocation0] sm:$0x1] %vm45_vm7, %v44_v38   ;;  %vm141_vm7 = vcmask 326944  }
  0x82   :  { %52 = vst.msk [vmem:[#allocation0] sm:$0x1] %vm51_vm8, %v50_v39   ;;  %vm147_vm8 = vcmask 294144  }
  0x84   :  { %v56_v40 = vpop.permute.xlu0 %55   ;;  %v62_v41 = vpop.permute.xlu1 %61  }
  0x85   :  { %58 = vst.msk [vmem:[#allocation0] sm:$0x1] %vm57_vm9, %v56_v40   ;;  %vm153_vm9 = vcmask 261344  }
  0x86   :  { %64 = vst.msk [vmem:[#allocation0] sm:$0x1] %vm63_vm10, %v62_v41   ;;  %vm159_vm10 = vcmask 228544  }
  0x88   :  { %v68_v42 = vpop.permute.xlu0 %67   ;;  %v74_v43 = vpop.permute.xlu1 %73  }
  0x89   :  { %70 = vst.msk [vmem:[#allocation0] sm:$0x1] %vm69_vm11, %v68_v42   ;;  %vm165_vm11 = vcmask 195744  }
  0x8a   :  { %76 = vst.msk [vmem:[#allocation0] sm:$0x1] %vm75_vm12, %v74_v43   ;;  %vm171_vm12 = vcmask 162944  }
  0x8c   :  { %v80_v44 = vpop.permute.xlu0 %79   ;;  %v86_v45 = vpop.permute.xlu1 %85  }
  0x8d   :  { %82 = vst.msk [vmem:[#allocation0] sm:$0x1] %vm81_vm13, %v80_v44   ;;  %vm177_vm13 = vcmask 130144  }
  0x8e   :  { %88 = vst.msk [vmem:[#allocation0] sm:$0x1] %vm87_vm14, %v86_v45   ;;  %vm183_vm14 = vcmask 97344  }
  0x90   :  { %v92_v46 = vpop.permute.xlu0 %91   ;;  %v98_v47 = vpop.permute.xlu1 %97  }
  0x91   :  { %94 = vst.msk [vmem:[#allocation0] sm:$0x1] %vm93_vm15, %v92_v46   ;;  %vm189_vm15 = vcmask 64544  }
  0x92   :  { %100 = vst.msk [vmem:[#allocation0] sm:$0x1] %vm99_vm0, %v98_v47  }
  0x94   :  { %v104_v48 = vpop.permute.xlu0 %103   ;;  %v110_v49 = vpop.permute.xlu1 %109  }
  0x95   :  { %106 = vst.msk [vmem:[#allocation0] sm:$0x1] %vm105_vm1, %v104_v48  }
  0x96   :  { %112 = vst.msk [vmem:[#allocation0] sm:$0x1] %vm111_vm2, %v110_v49  }
  0x98   :  { %v116_v50 = vpop.permute.xlu0 %115   ;;  %v122_v51 = vpop.permute.xlu1 %121  }
  0x99   :  { %118 = vst.msk [vmem:[#allocation0] sm:$0x1] %vm117_vm3, %v116_v50  }
  0x9a   :  { %124 = vst.msk [vmem:[#allocation0] sm:$0x1] %vm123_vm4, %v122_v51  }
  0x9c   :  { %v128_v52 = vpop.permute.xlu0 %127   ;;  %v134_v53 = vpop.permute.xlu1 %133  }
  0x9d   :  { %130 = vst.msk [vmem:[#allocation0] sm:$0x1] %vm129_vm5, %v128_v52  }
  0x9e   :  { %136 = vst.msk [vmem:[#allocation0] sm:$0x1] %vm135_vm6, %v134_v53  }
  0xa0   :  { %v140_v54 = vpop.permute.xlu0 %139   ;;  %v146_v55 = vpop.permute.xlu1 %145  }
  0xa1   :  { %142 = vst.msk [vmem:[#allocation0] sm:$0x1] %vm141_vm7, %v140_v54  }
  0xa2   :  { %148 = vst.msk [vmem:[#allocation0] sm:$0x1] %vm147_vm8, %v146_v55  }
  0xa4   :  { %v152_v56 = vpop.permute.xlu0 %151   ;;  %v158_v57 = vpop.permute.xlu1 %157  }
  0xa5   :  { %154 = vst.msk [vmem:[#allocation0] sm:$0x1] %vm153_vm9, %v152_v56  }
  0xa6   :  { %160 = vst.msk [vmem:[#allocation0] sm:$0x1] %vm159_vm10, %v158_v57  }
  0xa8   :  { %v164_v58 = vpop.permute.xlu0 %163   ;;  %v170_v59 = vpop.permute.xlu1 %169  }
  0xa9   :  { %166 = vst.msk [vmem:[#allocation0] sm:$0x1] %vm165_vm11, %v164_v58  }
  0xaa   :  { %172 = vst.msk [vmem:[#allocation0] sm:$0x1] %vm171_vm12, %v170_v59  }
  0xac   :  { %v176_v60 = vpop.permute.xlu0 %175   ;;  %v182_v61 = vpop.permute.xlu1 %181  }
  0xad   :  { %178 = vst.msk [vmem:[#allocation0] sm:$0x1] %vm177_vm13, %v176_v60  }
  0xae   :  { %184 = vst.msk [vmem:[#allocation0] sm:$0x1] %vm183_vm14, %v182_v61  }
  0xb0   :  { %v188_v62 = vpop.permute.xlu0 %187  }
  0xb1   :  { %190 = vst.msk [vmem:[#allocation0] sm:$0x1] %vm189_vm15, %v188_v62  }
  0xb8   :  { %v194_v63 = vld [vmem:[#allocation0] sm:$0x1] }
  0xb9   :  { %196 = vst [vmem:[%s400_s1] sm:$0x1] %v194_v63 }

// kernel: forward.1
= control target key start
LH: loop header
LB: loop body
LE: loop exit
PB: predicated region body
PF: predicated region fallthrough
CT: control target
= control target key end

     0   :  { %s2104_s29 = smov 0   ;;  %s2588_s0 = inlined_call_operand.vmem [shape: bf16[64,128], index: 0, kind: input, shape index: {}]   ;;  %s2589_s1 = inlined_call_operand.vmem [shape: bf16[384,384], index: 1, kind: input, shape index: {}]   ;;  %s2590_s2 = inlined_call_operand.vmem [shape: f32[1,128], index: 2, kind: input, shape index: {}]   ;;  %s2591_s3 = inlined_call_operand.vmem [shape: f32[1,256], index: 3, kind: input, shape index: {}]   ;;  %s2592_s4 = inlined_call_operand.vmem [shape: bf16[384,256], index: 4, kind: input, shape index: {}]   ;;  %s2593_s5 = inlined_call_operand.vmem [shape: f32[1,256], index: 5, kind: input, shape index: {}]   ;;  %s2594_s6 = inlined_call_operand.vmem [shape: f32[64,256], index: 6, kind: input, shape index: {}]   ;;  %s2595_s7 = inlined_call_operand.<no memory space> [shape: f32[1], index: 7, kind: input, shape index: {}]   ;;  %s2596_s8 = inlined_call_operand.vmem [shape: f32[64,256], index: 8, kind: output, shape index: {}]  }
   0x1   :  { %13 = sst [smem:[#allocation3]] %s2595_s7 }
   0x2 LB: > { %s1637_s30 = sadd.s32 4294967295, %s2052_s29   ;;  %p1641_p0 = scmp.ge.s32.totalorder %s2052_s29, 1  ;;  %s2052_s29 = sphi %s2104_s29, %s19_s29  }
   0x3   : > { %p276_p1 = scmp.lt.s32.totalorder %s2052_s29, 3 }
   0x5   : > { %p277_p2 = pnand %p1641_p0, %p276_p1 }
   0x6   : > { %v1876_v0 = vld [vmem:[%s2589_s1 + $0x4] ss:$12 sps:$4 sm:$0xff] (!%p277_p2)   ;;  %v1878_v1 = vld [vmem:[%s2589_s1] ss:$12 sps:$4 sm:$0xff] (!%p277_p2)   ;;  %v2054_v2 = vmov (!%p277_p2), 0.0   ;;  %s1642_s18 = sshll.u32 (!%p277_p2), %s1637_s30, 2 }
   0x7   : > { %280 = sbr.rel (%p277_p2) target bundleno = 595 (0x253), region = 52  ;;  %338 = vst [vmem:[#allocation2] sm:$0x1] (!%p277_p2), %v2054_v2  ;;  %339 = vst [vmem:[#allocation2 + $0x21] sm:$0x1] (!%p277_p2), %v2054_v2  ;;  %850 = vmatprep.subr.bf16.mxu0 (!%p277_p2), %v1876_v0  ;;  %p318_p3 = scmp.lt.s32.totalorder (!%p277_p2), %s1642_s18, 7 }
   0x8   : > { %v1879_v3 = vld [vmem:[%s2589_s1 + $0x1c] ss:$12 sps:$4 sm:$0xff] (!%p277_p2)   ;;  %851 = vmatpush1.bf16.msra.mxu0 (!%p277_p2), %v1878_v1  ;;  %v1881_v4 = vld [vmem:[%s2589_s1 + $0x18] ss:$12 sps:$4 sm:$0xff] (!%p277_p2)   ;;  %v1882_v5 = vld [vmem:[%s2589_s1 + $0x34] ss:$12 sps:$4 sm:$0xff] (!%p277_p2)  }
   0x9   : > { %852 = vmatprep.subr.bf16.mxu0 (!%p277_p2), %v1879_v3  ;;  %v1884_v6 = vld [vmem:[%s2589_s1 + $0x30] ss:$12 sps:$4 sm:$0xff] (!%p277_p2)   ;;  %v1885_v7 = vld [vmem:[%s2589_s1 + $0x4c] ss:$12 sps:$4 sm:$0xff] (!%p277_p2)   ;;  %v1887_v8 = vld [vmem:[%s2589_s1 + $0x48] ss:$12 sps:$4 sm:$0xff] (!%p277_p2)  }
   0xa   : > { %v1888_v9 = vld [vmem:[%s2589_s1 + $0x64] ss:$12 sps:$4 sm:$0xff] (!%p277_p2)   ;;  %v1890_v10 = vld [vmem:[%s2589_s1 + $0x60] ss:$12 sps:$4 sm:$0xff] (!%p277_p2)   ;;  %v1891_v11 = vld [vmem:[%s2589_s1 + $0x7c] ss:$12 sps:$4 sm:$0xff] (!%p277_p2)  }
   0xb   : > { %v1893_v12 = vld [vmem:[%s2589_s1 + $0x78] ss:$12 sps:$4 sm:$0xff] (!%p277_p2)   ;;  %v1894_v13 = vld [vmem:[%s2589_s1 + $0x94] ss:$12 sps:$4 sm:$0xff] (!%p277_p2)   ;;  %v1896_v21 = vld [vmem:[%s2589_s1 + $0x90] ss:$12 sps:$4 sm:$0xff] (!%p277_p2)  }
   0xc   : > { %853 = vmatpush1.bf16.msra.mxu0 (!%p277_p2), %v1881_v4  ;;  %v1897_v22 = vld [vmem:[%s2589_s1 + $0xac] ss:$12 sps:$4 sm:$0xff] (!%p277_p2)   ;;  %v1899_v23 = vld [vmem:[%s2589_s1 + $0xa8] ss:$12 sps:$4 sm:$0xff] (!%p277_p2)   ;;  %v1900_v24 = vld [vmem:[%s2589_s1 + $0xc4] ss:$12 sps:$4 sm:$0xff] (!%p277_p2)  }
   0xd   : > { %854 = vmatprep.subr.bf16.mxu0 (!%p277_p2), %v1882_v5  ;;  %v1902_v25 = vld [vmem:[%s2589_s1 + $0xc0] ss:$12 sps:$4 sm:$0xff] (!%p277_p2)   ;;  %v1903_v26 = vld [vmem:[%s2589_s1 + $0xdc] ss:$12 sps:$4 sm:$0xff] (!%p277_p2)   ;;  %v1905_v28 = vld [vmem:[%s2589_s1 + $0xd8] ss:$12 sps:$4 sm:$0xff] (!%p277_p2)  }
   0xe   : > { %s2598_s18 = smov (!%p318_p3, %s1642_s18), 7  ;;  %v1906_v30 = vld [vmem:[%s2589_s1 + $0xf4] ss:$12 sps:$4 sm:$0xff]   ;;  %v1908_v32 = vld [vmem:[%s2589_s1 + $0xf0] ss:$12 sps:$4 sm:$0xff]   ;;  %s1533_s26 = sld [smem:[#allocation3]] }
   0xf   : > { %s1643_s30 = sshll.u32 %s2598_s18, 2  ;;  %v1909_v33 = vld [vmem:[%s2589_s1 + $0x10c] ss:$12 sps:$4 sm:$0xff]   ;;  %v1956_v34 = vld [vmem:[%s2589_s1 + $0x188] ss:$12 sps:$4 sm:$0xff]   ;;  %s1773_s27 = sshll.u32 %s2598_s18, 4 }
  0x10   : > { %855 = vmatpush1.bf16.msra.mxu0 %v1884_v6  ;;  %s2151_s12 = scalar_lea.vmem %s2588_s0, %s1643_s30  ;;  %v1911_v35 = vld [vmem:[%s2589_s1 + $0x108] ss:$12 sps:$4 sm:$0xff]   ;;  %v1912_v36 = vld [vmem:[%s2589_s1 + $0x124] ss:$12 sps:$4 sm:$0xff]   ;;  %1822 = vmatprep.subr.bf16.mxu1 %v1956_v34  ;;  %v1959_v37 = vld [vmem:[%s2589_s1 + $0x1a0] ss:$12 sps:$4 sm:$0xff]   ;;  %s2550_s7 = scalar_lea.vmem %s2594_s6, %s1773_s27 }
  0x11   : > { %856 = vmatprep.subr.bf16.mxu0 %v1885_v7  ;;  %v1776_v14 = vld [vmem:[%s2151_s12] sm:$0xff]   ;;  %v1783_v15 = vld [vmem:[%s2151_s12 + $0x8] sm:$0xff]   ;;  %1823 = vmatpush3.bf16.msra.mxu1 %v1956_v34  ;;  %v1965_v42 = vld [vmem:[%s2589_s1 + $0x1d0] ss:$12 sps:$4 sm:$0xff]   ;;  %s2565_s16 = scalar_lea.vmem %s2596_s8, %s1773_s27 }
  0x12   : > { %v1777_v16 = vunpack.c.l.bf16 %v1776_v14  ;;  %v1778_v17 = vunpack.c.h.bf16 %v1776_v14  ;;  %v2162_v18 = vld [vmem:[%s2151_s12] sm:$0xff]  ;;  %v1781_v19 = vunpack.c.l.bf16 %v1783_v15  ;;  %v1782_v20 = vunpack.c.h.bf16 %v1783_v15  ;;  %v1915_v39 = vld [vmem:[%s2589_s1 + $0x13c] ss:$12 sps:$4 sm:$0xff]   ;;  %1824 = vmatprep.subr.bf16.mxu1 %v1959_v37  ;;  %v1921_v46 = vld [vmem:[%s2589_s1 + $0x16c] ss:$12 sps:$4 sm:$0xff]  }
  0x13   : > { %882 = vmatprep.mubr.bf16.mxu0 %v2162_v18  ;;  %v1914_v38 = vld [vmem:[%s2589_s1 + $0x120] ss:$12 sps:$4 sm:$0xff]   ;;  %v1962_v40 = vld [vmem:[%s2589_s1 + $0x1b8] ss:$12 sps:$4 sm:$0xff]   ;;  %v1968_v44 = vld [vmem:[%s2589_s1 + $0x1e8] ss:$12 sps:$4 sm:$0xff]  }
  0x14   : > { %857 = vmatpush1.bf16.msra.mxu0 %v1887_v8  ;;  %348 = vst [vmem:[#allocation2 + $0x1] sm:$0xff] %v1777_v16  ;;  %349 = vst [vmem:[#allocation2 + $0x9] sm:$0xff] %v1778_v17  ;;  %v1917_v41 = vld [vmem:[%s2589_s1 + $0x138] ss:$12 sps:$4 sm:$0xff]   ;;  %v1918_v43 = vld [vmem:[%s2589_s1 + $0x154] ss:$12 sps:$4 sm:$0xff]  }
  0x15   : > { %858 = vmatprep.subr.bf16.mxu0 %v1888_v9  ;;  %350 = vst [vmem:[#allocation2 + $0x11] sm:$0xff] %v1781_v19  ;;  %351 = vst [vmem:[#allocation2 + $0x19] sm:$0xff] %v1782_v20  ;;  %1825 = vmatpush3.bf16.msra.mxu1 %v1959_v37  ;;  %v1920_v45 = vld [vmem:[%s2589_s1 + $0x150] ss:$12 sps:$4 sm:$0xff]   ;;  %v1923_v47 = vld [vmem:[%s2589_s1 + $0x168] ss:$12 sps:$4 sm:$0xff]  }
  0x16   : > { %1826 = vmatprep.subr.bf16.mxu1 %v1962_v40  ;;  %v1971_v49 = vld [vmem:[%s2589_s1 + $0x200] ss:$12 sps:$4 sm:$0xff]   ;;  %v1927_v51 = vld [vmem:[%s2589_s1 + $0x184] ss:$12 sps:$4 sm:$0xff]   ;;  %v1930_v56 = vld [vmem:[%s2589_s1 + $0x19c] ss:$12 sps:$4 sm:$0xff]  }
  0x17   : > { %v1972_v53 = vld [vmem:[%s2589_s1 + $0x218] ss:$12 sps:$4 sm:$0xff]   ;;  %v1925_v54 = vld [vmem:[%s2589_s1 + $0x180] ss:$12 sps:$4 sm:$0xff]   ;;  %v1973_v58 = vld [vmem:[%s2589_s1 + $0x230] ss:$12 sps:$4 sm:$0xff]  }
  0x18   : > { %859 = vmatpush1.bf16.msra.mxu0 %v1890_v10  ;;  %v2255_v55 = vld [vmem:[%s2151_s12 + $0x8] sm:$0xff]  ;;  %v1928_v57 = vld [vmem:[%s2589_s1 + $0x198] ss:$12 sps:$4 sm:$0xff]   ;;  %v1933_v61 = vld [vmem:[%s2589_s1 + $0x1b4] ss:$12 sps:$4 sm:$0xff]   ;;  %v2055_v9 = vmov 0  }
  0x19   : > { %860 = vmatprep.subr.bf16.mxu0 %v1891_v11  ;;  %1827 = vmatpush3.bf16.msra.mxu1 %v1962_v40  ;;  %v1931_v62 = vld [vmem:[%s2589_s1 + $0x1b0] ss:$12 sps:$4 sm:$0xff]   ;;  %v1976_v0 = vld [vmem:[%s2592_s4 + $0x4] ss:$8 sps:$4 sm:$0xff]   ;;  %v1974_v4 = vld [vmem:[%s2592_s4] ss:$8 sps:$4 sm:$0xff]  }
  0x1a   : > { %1828 = vmatprep.subr.bf16.mxu1 %v1965_v42  ;;  %v1936_v3 = vld [vmem:[%s2589_s1 + $0x1cc] ss:$12 sps:$4 sm:$0xff]   ;;  %v1934_v5 = vld [vmem:[%s2589_s1 + $0x1c8] ss:$12 sps:$4 sm:$0xff]   ;;  %v1939_v8 = vld [vmem:[%s2589_s1 + $0x1e4] ss:$12 sps:$4 sm:$0xff]  }
  0x1b   : > { %v360_v27 = vld [vmem:[#allocation2 + $0x2] sm:$0xff]  ;;  %v1979_v7 = vld [vmem:[%s2592_s4 + $0x14] ss:$8 sps:$4 sm:$0xff]   ;;  %v1977_v10 = vld [vmem:[%s2592_s4 + $0x10] ss:$8 sps:$4 sm:$0xff]  }
  0x1c   : > { %861 = vmatpush1.bf16.msra.mxu0 %v1893_v12  ;;  %v361_v29 = vld [vmem:[#allocation2 + $0xa] sm:$0xff]  ;;  %v352_v48 = vld [vmem:[#allocation2] sm:$0xff]  ;;  %v355_v60 = vld [vmem:[#allocation2 + $0x18] sm:$0xff] }
  0x1d   : > { %862 = vmatprep.subr.bf16.mxu0 %v1894_v13  ;;  %v2189_v31 = vpack.c.bf16 %v361_v29, %v360_v27  ;;  %1829 = vmatpush3.bf16.msra.mxu1 %v1965_v42  ;;  %v353_v50 = vld [vmem:[#allocation2 + $0x8] sm:$0xff]  ;;  %v354_v59 = vld [vmem:[#allocation2 + $0x10] sm:$0xff]  ;;  %v363_v2 = vld [vmem:[#allocation2 + $0x1a] sm:$0xff] }
  0x1e   : > { %1830 = vmatprep.subr.bf16.mxu1 %v1968_v44  ;;  %v2246_v52 = vpack.c.bf16 %v353_v50, %v352_v48  ;;  %v2274_v63 = vpack.c.bf16 %v355_v60, %v354_v59  ;;  %v362_v1 = vld [vmem:[#allocation2 + $0x12] sm:$0xff]  ;;  %v1982_v11 = vld [vmem:[%s2592_s4 + $0x24] ss:$8 sps:$4 sm:$0xff]   ;;  %v1942_v13 = vld [vmem:[%s2589_s1 + $0x1fc] ss:$12 sps:$4 sm:$0xff]  }
  0x1f   : > { %1838 = vmatprep.mubr.bf16.mxu1 %v2189_v31  ;;  %v2289_v6 = vpack.c.bf16 %v363_v2, %v362_v1  ;;  %v1937_v12 = vld [vmem:[%s2589_s1 + $0x1e0] ss:$12 sps:$4 sm:$0xff]   ;;  %v1985_v15 = vld [vmem:[%s2592_s4 + $0x34] ss:$8 sps:$4 sm:$0xff]   ;;  %v1940_v16 = vld [vmem:[%s2589_s1 + $0x1f8] ss:$12 sps:$4 sm:$0xff]  }
  0x20   : > { %863 = vmatpush1.bf16.msra.mxu0 %v1896_v21  ;;  %v1980_v14 = vld [vmem:[%s2592_s4 + $0x20] ss:$8 sps:$4 sm:$0xff]   ;;  %v1983_v19 = vld [vmem:[%s2592_s4 + $0x30] ss:$8 sps:$4 sm:$0xff]   ;;  %v1988_v20 = vld [vmem:[%s2592_s4 + $0x44] ss:$8 sps:$4 sm:$0xff]  }
  0x21   : > { %864 = vmatprep.subr.bf16.mxu0 %v1897_v22  ;;  %1831 = vmatpush3.bf16.msra.mxu1 %v1968_v44  ;;  %v1946_v17 = vld [vmem:[%s2589_s1 + $0x214] ss:$12 sps:$4 sm:$0xff]   ;;  %v1944_v21 = vld [vmem:[%s2589_s1 + $0x210] ss:$12 sps:$4 sm:$0xff]   ;;  %v1949_v22 = vld [vmem:[%s2589_s1 + $0x22c] ss:$12 sps:$4 sm:$0xff]  }
  0x22   : > { %1832 = vmatprep.subr.bf16.mxu1 %v1971_v49  ;;  %v1989_v27 = vld [vmem:[%s2592_s4 + $0x50] ss:$8 sps:$4 sm:$0xff]   ;;  %v1951_v29 = vld [vmem:[%s2589_s1 + $0x8] ss:$12 sps:$4 sm:$0xff]   ;;  %v1953_v34 = vld [vmem:[%s2589_s1 + $0x20] ss:$12 sps:$4 sm:$0xff]  }
  0x23   : > { %v1955_v37 = vld [vmem:[%s2589_s1 + $0x38] ss:$12 sps:$4 sm:$0xff]   ;;  %v2003_v40 = vld [vmem:[%s2592_s4 + $0x94] ss:$8 sps:$4 sm:$0xff]   ;;  %v1964_v48 = vld [vmem:[%s2589_s1 + $0x80] ss:$12 sps:$4 sm:$0xff]  }
  0x24   : > { %865 = vmatpush1.bf16.msra.mxu0 %v1899_v23  ;;  %v1986_v23 = vld [vmem:[%s2592_s4 + $0x40] ss:$8 sps:$4 sm:$0xff]   ;;  %v2006_v44 = vld [vmem:[%s2592_s4 + $0xa4] ss:$8 sps:$4 sm:$0xff]   ;;  %v2007_v50 = vld [vmem:[%s2592_s4 + $0xb0] ss:$8 sps:$4 sm:$0xff]  }
  0x25   : > { %866 = vmatprep.subr.bf16.mxu0 %v1900_v24  ;;  %1833 = vmatpush3.bf16.msra.mxu1 %v1971_v49  ;;  %v1991_v24 = vld [vmem:[%s2592_s4 + $0x54] ss:$8 sps:$4 sm:$0xff]   ;;  %v1966_v49 = vld [vmem:[%s2589_s1 + $0x158] ss:$12 sps:$4 sm:$0xff]   ;;  %v2016_v59 = vld [vmem:[%s2592_s4 + $0xe0] ss:$8 sps:$4 sm:$0xff]  }
  0x26   : > { %1834 = vmatprep.subr.bf16.mxu1 %v1972_v53  ;;  %v1960_v42 = vld [vmem:[%s2589_s1 + $0x128] ss:$12 sps:$4 sm:$0xff]  }
  0x27   : > { %v2021_v60 = vld [vmem:[%s2592_s4 + $0xf4] ss:$8 sps:$4 sm:$0xff]  }
  0x28   : > { %867 = vmatpush1.bf16.msra.mxu0 %v1902_v25  ;;  %v1947_v25 = vld [vmem:[%s2589_s1 + $0x228] ss:$12 sps:$4 sm:$0xff]  }
  0x29   : > { %868 = vmatprep.subr.bf16.mxu0 %v1903_v26  ;;  %1835 = vmatpush3.bf16.msra.mxu1 %v1972_v53  ;;  %v1950_v26 = vld [vmem:[%s2589_s1 + $0xc8] ss:$12 sps:$4 sm:$0xff]   ;;  %v1969_v53 = vld [vmem:[%s2589_s1 + $0x170] ss:$12 sps:$4 sm:$0xff]  }
  0x2a   : > { %1836 = vmatprep.subr.bf16.mxu1 %v1973_v58 }
  0x2c   : > { %869 = vmatpush1.bf16.msra.mxu0 %v1905_v28  ;;  %v1994_v28 = vld [vmem:[%s2592_s4 + $0x64] ss:$8 sps:$4 sm:$0xff]  }
  0x2d   : > { %870 = vmatprep.subr.bf16.mxu0 %v1906_v30  ;;  %1837 = vmatpush3.bf16.msra.mxu1 %v1973_v58  ;;  %v1952_v30 = vld [vmem:[%s2589_s1 + $0xe0] ss:$12 sps:$4 sm:$0xff]   ;;  %v2015_v58 = vld [vmem:[%s2592_s4 + $0xd4] ss:$8 sps:$4 sm:$0xff]  }
  0x2e   : > { %1411 = vmatprep.subr.bf16.mxu1 %v1976_v0 }
  0x30   : > { %871 = vmatpush1.bf16.msra.mxu0 %v1908_v32  ;;  %1839 = vmatmul.mubr.bf16.vlgmr.msra.gmra.mrb[0].mxu1 %v2289_v6  ;;  %v1992_v32 = vld [vmem:[%s2592_s4 + $0x60] ss:$8 sps:$4 sm:$0xff]  }
  0x31   : > { %872 = vmatprep.subr.bf16.mxu0 %v1909_v33  ;;  %1412 = vmatpush1.bf16.msra.mxu1 %v1974_v4  ;;  %v1997_v33 = vld [vmem:[%s2592_s4 + $0x74] ss:$8 sps:$4 sm:$0xff]  }
  0x32   : > { %1413 = vmatprep.subr.bf16.mxu1 %v1979_v7 }
  0x34   : > { %873 = vmatpush1.bf16.msra.mxu0 %v1911_v35  ;;  %v1954_v35 = vld [vmem:[%s2589_s1 + $0xf8] ss:$12 sps:$4 sm:$0xff]  }
  0x35   : > { %874 = vmatprep.subr.bf16.mxu0 %v1912_v36  ;;  %1414 = vmatpush1.bf16.msra.mxu1 %v1977_v10  ;;  %v2000_v36 = vld [vmem:[%s2592_s4 + $0x84] ss:$8 sps:$4 sm:$0xff]  }
  0x36   : > { %1415 = vmatprep.subr.bf16.mxu1 %v1982_v11 }
  0x38   : > { %875 = vmatpush1.bf16.msra.mxu0 %v1914_v38  ;;  %v1957_v38 = vld [vmem:[%s2589_s1 + $0x110] ss:$12 sps:$4 sm:$0xff]  }
  0x39   : > { %876 = vmatprep.subr.bf16.mxu0 %v1915_v39  ;;  %1416 = vmatpush1.bf16.msra.mxu1 %v1980_v14  ;;  %v1998_v39 = vld [vmem:[%s2592_s4 + $0x80] ss:$8 sps:$4 sm:$0xff]  }
  0x3a   : > { %1417 = vmatprep.subr.bf16.mxu1 %v1985_v15 }
  0x3c   : > { %877 = vmatpush1.bf16.msra.mxu0 %v1917_v41  ;;  %v1958_v41 = vld [vmem:[%s2589_s1 + $0x50] ss:$12 sps:$4 sm:$0xff]  }
  0x3d   : > { %878 = vmatprep.subr.bf16.mxu0 %v1918_v43  ;;  %1418 = vmatpush1.bf16.msra.mxu1 %v1983_v19  ;;  %v2001_v43 = vld [vmem:[%s2592_s4 + $0x90] ss:$8 sps:$4 sm:$0xff]  }
  0x3e   : > { %1419 = vmatprep.subr.bf16.mxu1 %v1988_v20 }
  0x40   : > { %879 = vmatpush1.bf16.msra.mxu0 %v1920_v45  ;;  %v1963_v45 = vld [vmem:[%s2589_s1 + $0x140] ss:$12 sps:$4 sm:$0xff]  }
  0x41   : > { %880 = vmatprep.subr.bf16.mxu0 %v1921_v46  ;;  %1420 = vmatpush1.bf16.msra.mxu1 %v1986_v23  ;;  %v2004_v46 = vld [vmem:[%s2592_s4 + $0xa0] ss:$8 sps:$4 sm:$0xff]  }
  0x42   : > { %1421 = vmatprep.subr.bf16.mxu1 %v1991_v24  ;;  %v2022_v23 = vld [vmem:[%s2592_s4 + $0x100] ss:$8 sps:$4 sm:$0xff]  }
  0x44   : > { %881 = vmatpush1.bf16.msra.mxu0 %v1923_v47  ;;  %v2009_v47 = vld [vmem:[%s2592_s4 + $0xb4] ss:$8 sps:$4 sm:$0xff]  }
  0x45   : > { %903 = vmatprep.subr.bf16.mxu0 %v1927_v51  ;;  %1422 = vmatpush1.bf16.msra.mxu1 %v1989_v27  ;;  %v1967_v51 = vld [vmem:[%s2589_s1 + $0x98] ss:$12 sps:$4 sm:$0xff]   ;;  %v2027_v27 = vld [vmem:[%s2592_s4 + $0x114] ss:$8 sps:$4 sm:$0xff]  }
  0x46   : > { %1423 = vmatprep.subr.bf16.mxu1 %v1994_v28 }
  0x47   : > { %883 = vmatmul.mubr.bf16.vlgmr.msra.gmra.mrb[0].mxu0 %v2246_v52 }
  0x48   : > { %904 = vmatpush1.bf16.msra.mxu0 %v1925_v54  ;;  %892 = vmatprep.mubr.bf16.mxu0 %v2255_v55  ;;  %v1970_v54 = vld [vmem:[%s2589_s1 + $0xb0] ss:$12 sps:$4 sm:$0xff]  }
  0x49   : > { %905 = vmatprep.subr.bf16.mxu0 %v1930_v56  ;;  %1424 = vmatpush1.bf16.msra.mxu1 %v1992_v32  ;;  %v2012_v56 = vld [vmem:[%s2592_s4 + $0xc4] ss:$8 sps:$4 sm:$0xff]   ;;  %v2028_v32 = vld [vmem:[%s2592_s4 + $0x120] ss:$8 sps:$4 sm:$0xff]  }
  0x4a   : > { %1425 = vmatprep.subr.bf16.mxu1 %v1997_v33 }
  0x4c   : > { %906 = vmatpush1.bf16.msra.mxu0 %v1928_v57  ;;  %v2010_v57 = vld [vmem:[%s2592_s4 + $0xc0] ss:$8 sps:$4 sm:$0xff]  }
  0x4d   : > { %907 = vmatprep.subr.bf16.mxu0 %v1933_v61  ;;  %v2019_v61 = vld [vmem:[%s2592_s4 + $0xf0] ss:$8 sps:$4 sm:$0xff]  }
  0x4f   : > { %893 = vmatmul.mubr.bf16.gmra.mrb[4].mxu0 %v2274_v63 }
  0x50   : > { %908 = vmatpush1.bf16.msra.mxu0 %v1931_v62  ;;  %935 = vmatprep.mubr.bf16.mxu0 %v2055_v9  ;;  %v2024_v62 = vld [vmem:[%s2592_s4 + $0x104] ss:$8 sps:$4 sm:$0xff]  }
  0x51   : > { %909 = vmatprep.subr.bf16.mxu0 %v1936_v3  ;;  %v1722_v3 = vld [vmem:[%s2590_s2] ss:$0 sm:$0xff] }
  0x54   : > { %910 = vmatpush1.bf16.msra.mxu0 %v1934_v5 }
  0x55   : > { %911 = vmatprep.subr.bf16.mxu0 %v1939_v8 }
  0x58   : > { %912 = vmatpush1.bf16.msra.mxu0 %v1937_v12 }
  0x59   : > { %913 = vmatprep.subr.bf16.mxu0 %v1942_v13 }
  0x5c   : > { %914 = vmatpush1.bf16.msra.mxu0 %v1940_v16 }
  0x5d   : > { %915 = vmatprep.subr.bf16.mxu0 %v1946_v17 }
  0x60   : > { %916 = vmatpush1.bf16.msra.mxu0 %v1944_v21 }
  0x61   : > { %917 = vmatprep.subr.bf16.mxu0 %v1949_v22 }
  0x64   : > { %918 = vmatpush1.bf16.msra.mxu0 %v1947_v25 }
  0x65   : > { %1784 = vmatprep.subr.bf16.mxu0 %v1950_v26 }
  0x67   : > { %936 = vmatmul.mubr.bf16.vlgmr.msra.gmra.mrb[0].mxu0 %v2189_v31  ;;  %v1995_v31 = vld [vmem:[%s2592_s4 + $0x70] ss:$8 sps:$4 sm:$0xff]  }
  0x68   : > { %945 = vmatprep.mubr.bf16.mxu0 %v2055_v9  ;;  %1785 = vmatpush3.bf16.msra.mxu0 %v1951_v29  ;;  %v2025_v29 = vld [vmem:[%s2592_s4 + $0x110] ss:$8 sps:$4 sm:$0xff]  }
  0x69   : > { %1786 = vmatprep.subr.bf16.mxu0 %v1952_v30  ;;  %1426 = vmatpush1.bf16.msra.mxu1 %v1995_v31  ;;  %v2030_v30 = vld [vmem:[%s2592_s4 + $0x124] ss:$8 sps:$4 sm:$0xff]   ;;  %v2033_v31 = vld [vmem:[%s2592_s4 + $0x134] ss:$8 sps:$4 sm:$0xff]  }
  0x6a   : > { %1427 = vmatprep.subr.bf16.mxu1 %v2000_v36  ;;  %v2031_v36 = vld [vmem:[%s2592_s4 + $0x130] ss:$8 sps:$4 sm:$0xff]  }
  0x6c   : > { %1787 = vmatpush3.bf16.msra.mxu0 %v1953_v34 }
  0x6d   : > { %1788 = vmatprep.subr.bf16.mxu0 %v1954_v35  ;;  %1428 = vmatpush1.bf16.msra.mxu1 %v1998_v39  ;;  %v2039_v39 = vld [vmem:[%s2592_s4 + $0x154] ss:$8 sps:$4 sm:$0xff]  }
  0x6e   : > { %1429 = vmatprep.subr.bf16.mxu1 %v2003_v40 }
  0x6f   : > { %946 = vmatmul.mubr.bf16.gmra.mrb[4].mxu0 %v2289_v6 }
  0x70   : > { %1789 = vmatpush3.bf16.msra.mxu0 %v1955_v37  ;;  %988 = vmatprep.mubr.bf16.mxu0 %v2162_v18  ;;  %v1961_v18 = vld [vmem:[%s2589_s1 + $0x68] ss:$12 sps:$4 sm:$0xff]   ;;  %v2036_v37 = vld [vmem:[%s2592_s4 + $0x144] ss:$8 sps:$4 sm:$0xff]  }
  0x71   : > { %1790 = vmatprep.subr.bf16.mxu0 %v1957_v38  ;;  %1430 = vmatpush1.bf16.msra.mxu1 %v2001_v43  ;;  %v2034_v38 = vld [vmem:[%s2592_s4 + $0x140] ss:$8 sps:$4 sm:$0xff]  }
  0x72   : > { %1431 = vmatprep.subr.bf16.mxu1 %v2006_v44 }
  0x74   : > { %1791 = vmatpush3.bf16.msra.mxu0 %v1958_v41 }
  0x75   : > { %1792 = vmatprep.subr.bf16.mxu0 %v1960_v42  ;;  %1432 = vmatpush1.bf16.msra.mxu1 %v2004_v46  ;;  %v2037_v42 = vld [vmem:[%s2592_s4 + $0x150] ss:$8 sps:$4 sm:$0xff]  }
  0x76   : > { %1433 = vmatprep.subr.bf16.mxu1 %v2009_v47 }
  0x78   : > { %1793 = vmatpush3.bf16.msra.mxu0 %v1961_v18  ;;  %v2042_v18 = vld [vmem:[%s2592_s4 + $0x164] ss:$8 sps:$4 sm:$0xff]  }
  0x79   : > { %1794 = vmatprep.subr.bf16.mxu0 %v1963_v45  ;;  %1434 = vmatpush1.bf16.msra.mxu1 %v2007_v50  ;;  %v2045_v50 = vld [vmem:[%s2592_s4 + $0x174] ss:$8 sps:$4 sm:$0xff]  }
  0x7a   : > { %1435 = vmatprep.subr.bf16.mxu1 %v2012_v56 }
  0x7c   : > { %1795 = vmatpush3.bf16.msra.mxu0 %v1964_v48  ;;  %v2040_v48 = vld [vmem:[%s2592_s4 + $0x160] ss:$8 sps:$4 sm:$0xff]  }
  0x7d   : > { %1796 = vmatprep.subr.bf16.mxu0 %v1966_v49  ;;  %1436 = vmatpush1.bf16.msra.mxu1 %v2010_v57 }
  0x7e   : > { %1437 = vmatprep.subr.bf16.mxu1 %v2015_v58 }
  0x80   : > { %1797 = vmatpush3.bf16.msra.mxu0 %v1967_v51 }
  0x81   : > { %1798 = vmatprep.subr.bf16.mxu0 %v1969_v53 }
  0x84   : > { %1799 = vmatpush3.bf16.msra.mxu0 %v1970_v54  ;;  %v2043_v54 = vld [vmem:[%s2592_s4 + $0x170] ss:$8 sps:$4 sm:$0xff]  }
  0x87   : > { %989 = vmatmul.mubr.bf16.vlgmr.msra.gmra.mrb[8].mxu0 %v2246_v52  ;;  %v2013_v52 = vld [vmem:[%s2592_s4 + $0xd0] ss:$8 sps:$4 sm:$0xff]  }
  0x88   : > { %996 = vmatprep.mubr.bf16.mxu0 %v2255_v55  ;;  %1438 = vmatpush1.bf16.msra.mxu1 %v2013_v52  ;;  %v2018_v55 = vld [vmem:[%s2592_s4 + $0xe4] ss:$8 sps:$4 sm:$0xff]  }
  0x89   : > { %1439 = vmatprep.subr.bf16.mxu1 %v2018_v55 }
  0x8c   : > { %1440 = vmatpush1.bf16.msra.mxu1 %v2016_v59 }
  0x8d   : > { %1441 = vmatprep.subr.bf16.mxu1 %v2021_v60 }
  0x8f   : > { %997 = vmatmul.mubr.bf16.gmra.mrb[12].mxu0 %v2274_v63 }
  0x90   : > { %1442 = vmatpush1.bf16.msra.mxu1 %v2019_v61 }
  0x91   : > { %1464 = vmatprep.subr.bf16.mxu1 %v2024_v62 }
 0x103   : > { %v2465_v63 = vpop.f32.mrb[0].mxu1 }
 0x104   : > { %v2467_v0 = vpop.f32.mrb[1].mxu1 }
 0x105   : > { %v2469_v1 = vpop.f32.mrb[2].mxu1 }
 0x106   : > { %v2471_v2 = vpop.f32.mrb[3].mxu1 }
 0x13a   : > { %v937_v4 = vpop.f32.mrb[0].mxu0 }
 0x13b   : > { %v1061_v5 = vadd.f32 %v1722_v3, %v937_v4  ;;  %v2476_v6 = vpop.f32.mrb[1].mxu0  ;;  %v1071_v4 = vlaneseq }
 0x13c   : > { %v941_v7 = vpop.f32.mrb[2].mxu0 }
 0x13d   : > { %v1065_v8 = vmax.f32 %v1061_v5, 0.0  ;;  %v1062_v10 = vadd.f32 %v1722_v3, %v941_v7  ;;  %v2478_v11 = vpop.f32.mrb[3].mxu0  ;;  %v1072_v5 = vshrl.u32 %v1071_v4, 7 }
 0x13f   : > { %1089 = vst [vmem:[#allocation2 + $0x1] sm:$0xff] %v1065_v8  ;;  %v1066_v12 = vmax.f32 %v1062_v10, 0.0  ;;  %v1073_v7 = vsub.s32 0, %v1072_v5  ;;  %v1525_v10 = vld [vmem:[%s2550_s7] sm:$0xff] }
 0x141   : > { %1090 = vst [vmem:[#allocation2 + $0x9] sm:$0xff] %v1066_v12  ;;  %v1106_v13 = vpack.c.bf16 %v1066_v12, %v1065_v8  ;;  %v1069_v8 = vld [vmem:[%s2591_s3] sm:$0x3]  ;;  %v1534_v12 = vstv %s1533_s26 }
 0x142   : > { %v947_v14 = vpop.f32.mrb[4].mxu0 }
 0x143   : > { %v1063_v15 = vadd.f32 %v1722_v3, %v947_v14  ;;  %v2480_v16 = vpop.f32.mrb[5].mxu0  ;;  %1443 = vmatprep.mubr.bf16.mxu1 %v1106_v13  ;;  %v1526_v14 = vld [vmem:[%s2550_s7 + $0x8] sm:$0xff] }
 0x144   : > { %v951_v17 = vpop.f32.mrb[6].mxu0 }
 0x145   : > { %v1067_v19 = vmax.f32 %v1063_v15, 0.0  ;;  %v1064_v20 = vadd.f32 %v1722_v3, %v951_v17  ;;  %v2482_v21 = vpop.f32.mrb[7].mxu0  ;;  %v1527_v17 = vld [vmem:[%s2550_s7 + $0x10] sm:$0xff] }
 0x146   : > { %v1093_v24 = vld [vmem:[#allocation2] sm:$0xff] }
 0x147   : > { %1091 = vst [vmem:[#allocation2 + $0x11] sm:$0xff] %v1067_v19  ;;  %v1068_v22 = vmax.f32 %v1064_v20, 0.0 }
 0x148   : > { %v1094_v25 = vld [vmem:[#allocation2 + $0x8] sm:$0xff] }
 0x149   : > { %1092 = vst [vmem:[#allocation2 + $0x19] sm:$0xff] %v1068_v22  ;;  %v1105_v26 = vpack.c.bf16 %v1094_v25, %v1093_v24  ;;  %v1109_v28 = vpack.c.bf16 %v1068_v22, %v1067_v19  ;;  %v1101_v60 = vld [vmem:[#allocation2 + $0x2] sm:$0xff]  ;;  %v1074_v19 = vrot.slane %v1069_v8, %v1073_v7  ;;  %v1535_v22 = vmul.f32 %v1534_v12, %v1525_v10  ;;  %v1528_v24 = vld [vmem:[%s2550_s7 + $0x18] sm:$0xff] }
 0x14b   : > { %1444 = vmatmul.mubr.bf16.vlgmr.msra.gmra.mrb[4].mxu1 %v1105_v26 }
 0x14c   : > { %1465 = vmatpush1.bf16.msra.mxu1 %v2022_v23  ;;  %1453 = vmatprep.mubr.bf16.mxu1 %v1109_v28 }
 0x14d   : > { %1466 = vmatprep.subr.bf16.mxu1 %v2027_v27  ;;  %v1536_v27 = vmul.f32 %v1534_v12, %v1526_v14 }
 0x14e   : > { %v1095_v33 = vld [vmem:[#allocation2 + $0x10] sm:$0xff] }
 0x14f   : > { %v1102_v52 = vld [vmem:[#allocation2 + $0xa] sm:$0xff] }
 0x150   : > { %1467 = vmatpush1.bf16.msra.mxu1 %v2025_v29  ;;  %v1096_v34 = vld [vmem:[#allocation2 + $0x18] sm:$0xff]  ;;  %v1107_v62 = vpack.c.bf16 %v1102_v52, %v1101_v60 }
 0x151   : > { %1468 = vmatprep.subr.bf16.mxu1 %v2030_v30  ;;  %v1108_v35 = vpack.c.bf16 %v1096_v34, %v1095_v33 }
 0x153   : > { %1454 = vmatmul.mubr.bf16.gmra.mrb[8].mxu1 %v1108_v35 }
 0x154   : > { %1469 = vmatpush1.bf16.msra.mxu1 %v2028_v32  ;;  %1496 = vmatprep.mubr.bf16.mxu1 %v2055_v9  ;;  %v1537_v32 = vmul.f32 %v1534_v12, %v1527_v17 }
 0x155   : > { %1470 = vmatprep.subr.bf16.mxu1 %v2033_v31  ;;  %v1538_v31 = vmul.f32 %v1534_v12, %v1528_v24 }
 0x158   : > { %1471 = vmatpush1.bf16.msra.mxu1 %v2031_v36  ;;  %v1081_v36 = vadd.f32 %v1074_v19, %v2476_v6 }
 0x159   : > { %1472 = vmatprep.subr.bf16.mxu1 %v2036_v37 }
 0x15a   : > { %v1800_v40 = vpop.f32.mrb[8].mxu0 }
 0x15b   : > { %v1801_v41 = vpop.f32.mrb[9].mxu0 }
 0x15c   : > { %1473 = vmatpush1.bf16.msra.mxu1 %v2034_v38  ;;  %v1802_v43 = vadd.f32 %v1801_v41, %v1800_v40  ;;  %v1803_v44 = vpop.f32.mrb[10].mxu0 }
 0x15d   : > { %1474 = vmatprep.subr.bf16.mxu1 %v2039_v39  ;;  %v1804_v45 = vpop.f32.mrb[11].mxu0 }
 0x15e   : > { %v1805_v46 = vadd.f32 %v1804_v45, %v1803_v44  ;;  %v1040_v47 = vadd.f32 %v1802_v43, %v2467_v0  ;;  %v1103_v0 = vld [vmem:[#allocation2 + $0x12] sm:$0xff]  ;;  %v1083_v43 = vadd.f32 %v1074_v19, %v2478_v11 }
 0x160   : > { %1475 = vmatpush1.bf16.msra.mxu1 %v2037_v42  ;;  %v2526_v49 = vadd.f32 %v1805_v46, %v2471_v2  ;;  %v1104_v2 = vld [vmem:[#allocation2 + $0x1a] sm:$0xff] }
 0x161   : > { %1476 = vmatprep.subr.bf16.mxu1 %v2042_v18  ;;  %v1110_v3 = vpack.c.bf16 %v1104_v2, %v1103_v0  ;;  %v1529_v42 = vld [vmem:[%s2550_s7 + $0x20] sm:$0xff]  ;;  %v1530_v18 = vld [vmem:[%s2550_s7 + $0x28] sm:$0xff] }
 0x162   : > { %v1806_v51 = vpop.f32.mrb[12].mxu0  ;;  %v1540_v52 = vmul.f32 %v1534_v12, %v1530_v18 }
 0x163   : > { %v1807_v53 = vpop.f32.mrb[13].mxu0 }
 0x164   : > { %1477 = vmatpush1.bf16.msra.mxu1 %v2040_v48  ;;  %v1808_v56 = vadd.f32 %v1807_v53, %v1806_v51  ;;  %v1809_v57 = vpop.f32.mrb[14].mxu0 }
 0x165   : > { %1478 = vmatprep.subr.bf16.mxu1 %v2045_v50  ;;  %v1810_v58 = vpop.f32.mrb[15].mxu0  ;;  %v1531_v50 = vld [vmem:[%s2550_s7 + $0x30] sm:$0xff] }
 0x166   : > { %v2535_v55 = vadd.f32 %v2465_v63, %v1808_v56  ;;  %v1811_v59 = vadd.f32 %v1810_v58, %v1809_v57  ;;  %v1159_v63 = vld [vmem:[%s2593_s5] sm:$0x3]  ;;  %v1532_v57 = vld [vmem:[%s2550_s7 + $0x38] sm:$0xff] }
 0x167   : > { %v1542_v4 = vmul.f32 %v1534_v12, %v1532_v57 }
 0x168   : > { %1479 = vmatpush1.bf16.msra.mxu1 %v2043_v54  ;;  %v2538_v61 = vadd.f32 %v2469_v1, %v1811_v59  ;;  %v1164_v1 = vrot.slane %v1159_v63, %v1073_v7  ;;  %v1539_v54 = vmul.f32 %v1534_v12, %v1529_v42 }
 0x16b   : > { %1497 = vmatmul.mubr.bf16.vlgmr.msra.gmra.mrb[4].mxu1 %v1107_v62  ;;  %v1541_v62 = vmul.f32 %v1534_v12, %v1531_v50 }
 0x16c   : > { %1506 = vmatprep.mubr.bf16.mxu1 %v2055_v9  ;;  %v1077_v9 = vsub.s32 1, %v1072_v5  ;;  %v1085_v5 = vadd.f32 %v1074_v19, %v2480_v16 }
 0x16e   : > { %v1168_v13 = vrot.slane %v1159_v63, %v1077_v9  ;;  %v1078_v25 = vrot.slane %v1069_v8, %v1077_v9 }
 0x170   : > { %v1082_v39 = vadd.f32 %v1078_v25, %v1040_v47  ;;  %v1084_v45 = vadd.f32 %v1078_v25, %v2526_v49  ;;  %v1086_v9 = vadd.f32 %v1078_v25, %v2535_v55  ;;  %v1088_v17 = vadd.f32 %v1078_v25, %v2538_v61 }
 0x173   : > { %1507 = vmatmul.mubr.bf16.gmra.mrb[8].mxu1 %v1110_v3 }
 0x23e   : > { %v1498_v15 = vpop.f32.mrb[4].mxu1 }
 0x23f   : > { %v1842_v20 = vadd.f32 %v1498_v15, %v1164_v1  ;;  %v1500_v23 = vpop.f32.mrb[5].mxu1 }
 0x240   : > { %v1843_v26 = vadd.f32 %v1500_v23, %v1168_v13  ;;  %v1502_v28 = vpop.f32.mrb[6].mxu1 }
 0x241   : > { %v1517_v29 = vmax.f32 %v1842_v20, 0.0  ;;  %v1844_v30 = vadd.f32 %v1502_v28, %v1164_v1  ;;  %v1504_v33 = vpop.f32.mrb[7].mxu1 }
 0x242   : > { %v1518_v34 = vmax.f32 %v1843_v26, 0.0  ;;  %v1845_v35 = vadd.f32 %v1504_v33, %v1168_v13 }
 0x243   : > { %v1543_v37 = vadd.f32 %v1535_v22, %v1517_v29  ;;  %v1519_v38 = vmax.f32 %v1844_v30, 0.0 }
 0x244   : > { %v1544_v40 = vadd.f32 %v1536_v27, %v1518_v34  ;;  %v1520_v41 = vmax.f32 %v1845_v35, 0.0 }
 0x245   : > { %v1551_v44 = vadd.f32 %v1543_v37, %v1081_v36  ;;  %v1545_v6 = vadd.f32 %v1537_v32, %v1519_v38 }
 0x246   : > { %v1552_v46 = vadd.f32 %v1544_v40, %v1082_v39  ;;  %v1546_v47 = vadd.f32 %v1538_v31, %v1520_v41  ;;  %v1508_v48 = vpop.f32.mrb[8].mxu1 }
 0x247   : > { %1559 = vst [vmem:[%s2565_s16] sm:$0xff] %v1551_v44  ;;  %v1553_v51 = vadd.f32 %v1545_v6, %v1083_v43  ;;  %v1846_v53 = vadd.f32 %v1508_v48, %v1164_v1  ;;  %v1510_v56 = vpop.f32.mrb[9].mxu1 }
 0x248   : > { %1560 = vst [vmem:[%s2565_s16 + $0x8] sm:$0xff] %v1552_v46  ;;  %v1554_v58 = vadd.f32 %v1546_v47, %v1084_v45  ;;  %v1847_v11 = vadd.f32 %v1510_v56, %v1168_v13  ;;  %v1512_v59 = vpop.f32.mrb[10].mxu1 }
 0x249   : > { %1561 = vst [vmem:[%s2565_s16 + $0x10] sm:$0xff] %v1553_v51  ;;  %v1521_v60 = vmax.f32 %v1846_v53, 0.0  ;;  %v1848_v49 = vadd.f32 %v1512_v59, %v1164_v1  ;;  %v1514_v0 = vpop.f32.mrb[11].mxu1  ;;  %v1087_v1 = vadd.f32 %v1074_v19, %v2482_v21 }
 0x24a   : > { %1562 = vst [vmem:[%s2565_s16 + $0x18] sm:$0xff] %v1554_v58  ;;  %v1522_v2 = vmax.f32 %v1847_v11, 0.0  ;;  %v1849_v3 = vadd.f32 %v1514_v0, %v1168_v13 }
 0x24b   : > { %v1547_v63 = vadd.f32 %v1539_v54, %v1521_v60  ;;  %v1523_v7 = vmax.f32 %v1848_v49, 0.0 }
 0x24c   : > { %v1548_v8 = vadd.f32 %v1540_v52, %v1522_v2  ;;  %v1524_v10 = vmax.f32 %v1849_v3, 0.0 }
 0x24d   : > { %v1555_v14 = vadd.f32 %v1547_v63, %v1085_v5  ;;  %v1549_v15 = vadd.f32 %v1541_v62, %v1523_v7 }
 0x24e   : > { %v1556_v20 = vadd.f32 %v1548_v8, %v1086_v9  ;;  %v1550_v13 = vadd.f32 %v1542_v4, %v1524_v10 }
 0x24f   : > { %1563 = vst [vmem:[%s2565_s16 + $0x20] sm:$0xff] %v1555_v14  ;;  %v1557_v12 = vadd.f32 %v1549_v15, %v1087_v1 }
 0x250   : > { %1564 = vst [vmem:[%s2565_s16 + $0x28] sm:$0xff] %v1556_v20  ;;  %v1558_v16 = vadd.f32 %v1550_v13, %v1088_v17 }
 0x251   : > { %1565 = vst [vmem:[%s2565_s16 + $0x30] sm:$0xff] %v1557_v12 }
 0x252   : > { %1566 = vst [vmem:[%s2565_s16 + $0x38] sm:$0xff] %v1558_v16 }
 0x253 PF: > { %s19_s29 = sadd.s32 1, %s2052_s29  }
 0x254   : > { %p16_p4 = scmp.ge.s32.totalorder %s19_s29, 4  }
 0x256   :  { %18 = sbr.rel (!%p16_p4) target bundleno = 2 (0x2), region = 85 }

</bundles_post_ra>
